<compile_context>
chip_gen: v6e
topology: v6e:2x2x1
jax: 0.10.0
libtpu: 0.0.40
codegen_flags: <defaults>
</compile_context>

<pallas_src>
import math

import jax
import jax.numpy as jnp
from jax.experimental import pallas as pl
from jax.experimental.pallas import tpu as pltpu


def _round_up(x, m):
    return ((x + m - 1) // m) * m


# ---------------------------------------------------------------------------
# Kernel
# ---------------------------------------------------------------------------
def _make_kernel(D, Dp, S, Sp, S_out):
    """Fused forward kernel for one batch tile.

    Refs:
      xn_ref     [TB, Fn_p]        src node features (zero-padded)
      xs_ref     [TB, Sp, Fcat_p]  concat(neighbor, edge, edge_time), padded
      wn_ref     [Fn_p, Dp]        node_transform weight
      wc_ref     [Fcat_p, Dp]      fused (neighbor|edge|time)/3 weight
      wattn_ref  [5, Dp, Dp]       wq*scale | wk | wv | wo | head_mask
      vec_ref    [16, Dp]          bn, b_comb, bq*scale, bk, bv, bo,
                                   ln1_g, ln1_b, ln2_g, ln2_b, (zero rows)
      out_ref    [TB, Dp]
      attn_ref   [TB, S_out]       head-averaged attention weights, lane-padded
    """
    f32 = jnp.float32
    inv_d = 1.0 / D

    def kernel(xn_ref, xs_ref, wn_ref, wc_ref, wattn_ref, vec_ref,
               out_ref, attn_ref):
        xn = xn_ref[...]                               # [TB, Fn_p]
        xs = xs_ref[...]                               # [TB, Sp, Fcat_p]
        TB = xn.shape[0]
        N = TB * Sp

        wn = wn_ref[...]                               # [Fn_p, Dp]
        cdt = wn.dtype                                 # MXU compute dtype
        wc = wc_ref[...]                               # [Fcat_p, Dp] (already /3)
        wq = wattn_ref[0]                              # [Dp, Dp], 1/sqrt(hd) folded
        wk = wattn_ref[1]
        wv = wattn_ref[2]
        wo = wattn_ref[3]
        head_mask = wattn_ref[4]                       # [Dp, Dp] block-diag 0/1

        vecs = vec_ref[...].astype(f32)                # [16, Dp]
        bn, bc, bq, bk, bv, bo = (vecs[r:r + 1, :] for r in range(6))
        g1, b1, g2, b2 = (vecs[r:r + 1, :] for r in range(6, 10))

        # ---- fused input projections (MXU) ---------------------------------
        node_h = jnp.dot(xn.astype(cdt), wn, preferred_element_type=f32) + bn
        # combined = (neighbor_h + edge_h + edge_time_h) / 3, as ONE matmul.
        comb = jnp.dot(xs.reshape(N, -1).astype(cdt), wc,
                       preferred_element_type=f32) + bc               # [N, Dp]

        # ---- Q / K / V projections (lane-aligned weight slabs) --------------
        qp = jnp.dot(node_h.astype(cdt), wq, preferred_element_type=f32) + bq
        comb_c = comb.astype(cdt)
        kp = (jnp.dot(comb_c, wk, preferred_element_type=f32) + bk
              ).reshape(TB, Sp, Dp)
        vp = (jnp.dot(comb_c, wv, preferred_element_type=f32) + bv
              ).reshape(TB, Sp, Dp)

        # ---- multi-head attention (q_len == 1), all heads at once -----------
        # prod[b,s,d] = q[b,d]*k[b,s,d]; contracting with the block-diagonal
        # head_mask sums within each head and broadcasts that head's score back
        # across its hd lanes, so ONE lane-dense softmax covers all heads.
        prod = qp[:, None, :] * kp                                     # [TB,Sp,Dp]
        scores = jnp.dot(prod.reshape(N, Dp).astype(cdt), head_mask,
                         preferred_element_type=f32).reshape(TB, Sp, Dp)
        if Sp > S:   # mask padded key positions out of the softmax
            s_idx = jax.lax.broadcasted_iota(jnp.int32, (1, Sp, 1), 1)
            scores = jnp.where(s_idx < S, scores, -1e30)

        m = jnp.max(scores, axis=1, keepdims=True)
        p = jnp.exp(scores - m)
        denom = jnp.sum(p, axis=1, keepdims=True)
        p = p * pl.reciprocal(denom, approx=True)                      # [TB,Sp,Dp]

        ctx = jnp.sum(p * vp, axis=1)                                  # [TB, Dp]
        attn_out = jnp.dot(ctx.astype(cdt), wo,
                           preferred_element_type=f32) + bo            # [TB, Dp]

        # Head-averaged attention weights (PyTorch average_attn_weights=True).
        # Each head's prob is replicated over its hd lanes; padded d-lanes are
        # excluded so the lane sum / D equals the over-heads mean.
        if Dp > D:
            d_idx = jax.lax.broadcasted_iota(jnp.int32, (1, 1, Dp), 2)
            attn_mean = jnp.sum(jnp.where(d_idx < D, p, 0.0), axis=2) * inv_d
        else:
            attn_mean = jnp.sum(p, axis=2) * inv_d                     # [TB, Sp]
        if S_out > Sp:   # lane-dense 128-wide output slab (unmasked stores)
            attn_mean = jnp.concatenate(
                [attn_mean, jnp.zeros((TB, S_out - Sp), f32)], axis=-1)

        # ---- residual + LayerNorms ------------------------------------------
        # Padded D lanes of every operand (and of gamma/beta) are exactly zero,
        # so sum/D and sum(x^2)/D over Dp lanes give the true-D statistics and
        # padded output lanes stay zero.
        def layer_norm(x, g, b, eps=1e-5):
            mu = jnp.sum(x, axis=-1, keepdims=True) * inv_d
            msq = jnp.sum(x * x, axis=-1, keepdims=True) * inv_d
            var = msq - mu * mu
            return (x - mu) * jax.lax.rsqrt(var + eps) * g + b

        out1 = layer_norm(node_h + attn_out, g1, b1)   # LN1(query + attn_out)
        out2 = layer_norm(out1 + node_h, g2, b2)       # LN2(output + node_h)
        # TODO(synk): nn.Dropout / attention dropout are identity in eval mode;
        #             training-mode dropout is not implemented.

        out_ref[...] = out2.astype(out_ref.dtype)
        attn_ref[...] = attn_mean

    return kernel


# ---------------------------------------------------------------------------
# Host-side tiling policy, packing, wrapper
# ---------------------------------------------------------------------------
def _derive_tiling(batch, Sp, Fn_p, Fcat_p, Dp, S_out, act_bytes, block_b=None):
    """Pick a batch tile + vmem limit from the per-generation VMEM capacity."""
    try:
        vmem_cap = int(pltpu.get_tpu_info().vmem_capacity_bytes)
    except Exception:
        vmem_cap = 64 * 1024 * 1024      # conservative: v7x per-TC VMEM

    # Loop-invariant weight slabs (constant index_map keeps them resident;
    # budget them double-buffered to stay conservative).
    weight_bytes = 2 * ((Fn_p * Dp + Fcat_p * Dp + 5 * Dp * Dp) * act_bytes
                        + 16 * Dp * 4)

    # Per-batch-row footprint: double-buffered streamed operands plus the live
    # f32 [Sp, Dp] temporaries (comb, k, v, prod/scores, p, ...).
    per_row = (2 * Fn_p * act_bytes             # src-node input (x2 pipeline)
               + 2 * Sp * Fcat_p * act_bytes    # sequence input (x2 pipeline)
               + 2 * Dp * 4                     # node output    (x2 pipeline)
               + 2 * S_out * 4                  # attn output    (x2 pipeline)
               + 8 * Sp * Dp * 4                # live f32 [Sp, Dp] temporaries
               + 6 * Dp * 4)                    # live f32 [Dp] row vectors

    if block_b is None:
        budget = int(vmem_cap * 0.7) - weight_bytes
        block_b = max(8, min(512, (max(budget, 0) // per_row) // 8 * 8))
    block_b = min(block_b, _round_up(batch, 8))
    block_b = max(8, (block_b // 8) * 8)

    vmem_limit = weight_bytes + block_b * per_row + (4 << 20)
    vmem_limit = max(16 << 20, min(int(vmem_cap * 0.9), vmem_limit))
    return int(block_b), int(vmem_limit)


def pack_params(params, n_head, dtype=jnp.float32):
    """Fold & concatenate the 20 per-layer tensors into lane-aligned slabs."""
    Fn, D = params["wn"].shape
    assert D % n_head == 0
    hd = D // n_head
    scale = 1.0 / math.sqrt(hd)

    Fnb = params["wnb"].shape[0]
    Fe = params["we"].shape[0]
    Ft = params["wt"].shape[0]
    Fcat = Fnb + Fe + Ft

    Dp = _round_up(D, 128)
    Fn_p = _round_up(Fn, 8)
    Fcat_p = _round_up(Fcat, 128)

    def pad2(a, rows, cols):
        return jnp.pad(a, ((0, rows - a.shape[0]), (0, cols - a.shape[1])))

    # node transform
    wn = pad2(params["wn"], Fn_p, Dp).astype(dtype)

    # neighbor/edge/time projections fused; the /3 folded into weight & bias.
    w_comb = jnp.concatenate([params["wnb"], params["we"], params["wt"]],
                             axis=0) / 3.0
    w_comb = pad2(w_comb, Fcat_p, Dp).astype(dtype)
    b_comb = (params["bnb"] + params["be"] + params["bt"]) / 3.0

    # attention weights packed [5, Dp, Dp]: q(scale folded)|k|v|out|head-mask.
    ids = jnp.arange(D) // hd
    head_mask = (ids[:, None] == ids[None, :]).astype(jnp.float32)
    w_attn = jnp.stack([
        pad2(params["wq"] * scale, Dp, Dp),
        pad2(params["wk"], Dp, Dp),
        pad2(params["wv"], Dp, Dp),
        pad2(params["wo"], Dp, Dp),
        pad2(head_mask, Dp, Dp),
    ], axis=0).astype(dtype)

    vec_rows = [params["bn"], b_comb, params["bq"] * scale, params["bk"],
                params["bv"], params["bo"], params["g1"], params["b1"],
                params["g2"], params["b2"]]
    vecs = jnp.concatenate([pad2(v, 1, Dp) for v in vec_rows], axis=0)
    vecs = jnp.pad(vecs, ((0, 16 - vecs.shape[0]), (0, 0))).astype(jnp.float32)

    return {"wn": wn, "w_comb": w_comb, "w_attn": w_attn, "vecs": vecs,
            "D": D, "Dp": Dp, "Fn": Fn, "Fn_p": Fn_p,
            "Fcat": Fcat, "Fcat_p": Fcat_p,
            "n_head": n_head, "dtype": dtype}


def temporal_attention_forward(src_node_features, src_time_features,
                               neighbor_features, edge_time_features,
                               edge_features, packed, mask=None, block_b=None):
    # TODO(synk): key_padding_mask path not implemented (mask=None path only).
    del mask
    # `time_h = time_transform(src_time_features)` in the reference forward is
    # dead code (never used), so src_time_features is ignored here.
    del src_time_features

    batch = min(src_node_features.shape[0], neighbor_features.shape[0],
                edge_features.shape[0], edge_time_features.shape[0])
    src_node = src_node_features[:batch]
    neighbor = neighbor_features[:batch]
    edge = edge_features[:batch]
    edge_time = edge_time_features[:batch]

    S = min(neighbor.shape[1], edge.shape[1], edge_time.shape[1])
    neighbor, edge, edge_time = neighbor[:, :S], edge[:, :S], edge_time[:, :S]

    D, Dp = packed["D"], packed["Dp"]
    Fn, Fn_p = packed["Fn"], packed["Fn_p"]
    Fcat, Fcat_p = packed["Fcat"], packed["Fcat_p"]
    act_dtype = packed["dtype"]
    out_dtype = src_node.dtype

    Sp = _round_up(S, 8)
    S_out = _round_up(Sp, 128)

    # One contiguous, zero-padded sequence operand -> single DMA + one fused
    # projection; padding keeps every in-kernel reshape (8,128)-aligned.
    x_seq = jnp.concatenate([neighbor, edge, edge_time], axis=-1)
    x_seq = jnp.pad(x_seq, ((0, 0), (0, Sp - S), (0, Fcat_p - Fcat)))
    x_seq = x_seq.astype(act_dtype)
    src_node_p = jnp.pad(src_node, ((0, 0), (0, Fn_p - Fn))).astype(act_dtype)

    block_b, vmem_limit = _derive_tiling(
        batch, Sp, Fn_p, Fcat_p, Dp, S_out,
        jnp.dtype(act_dtype).itemsize, block_b=block_b)

    # Pad the batch to a whole number of tiles; slice outputs back afterwards.
    Bp = _round_up(batch, block_b)
    if Bp > batch:
        x_seq = jnp.pad(x_seq, ((0, Bp - batch), (0, 0), (0, 0)))
        src_node_p = jnp.pad(src_node_p, ((0, Bp - batch), (0, 0)))
    grid = (Bp // block_b,)

    out, attn = pl.pallas_call(
        _make_kernel(D, Dp, S, Sp, S_out),
        out_shape=(jax.ShapeDtypeStruct((Bp, Dp), out_dtype),
                   jax.ShapeDtypeStruct((Bp, S_out), jnp.float32)),
        grid=grid,
        in_specs=[
            pl.BlockSpec((block_b, Fn_p), lambda i: (i, 0)),
            pl.BlockSpec((block_b, Sp, Fcat_p), lambda i: (i, 0, 0)),
            # Weights: constant index_map -> VMEM-resident across grid steps.
            pl.BlockSpec((Fn_p, Dp), lambda i: (0, 0)),
            pl.BlockSpec((Fcat_p, Dp), lambda i: (0, 0)),
            pl.BlockSpec((5, Dp, Dp), lambda i: (0, 0, 0)),
            pl.BlockSpec((16, Dp), lambda i: (0, 0)),
        ],
        out_specs=(
            pl.BlockSpec((block_b, Dp), lambda i: (i, 0)),
            pl.BlockSpec((block_b, S_out), lambda i: (i, 0)),
        ),
        compiler_params=pltpu.CompilerParams(
            dimension_semantics=("parallel",),   # megacore / v7x 2-TC sharding
            vmem_limit_bytes=vmem_limit,
        ),
    )(src_node_p, x_seq, packed["wn"], packed["w_comb"], packed["w_attn"],
      packed["vecs"])

    # PyTorch MHA returns head-averaged weights with shape [B, q_len=1, S].
    return out[:batch, :D], attn[:batch, :S].reshape(batch, 1, S)


# ---------------------------------------------------------------------------
# Parameter init (PyTorch-style) and a pure-JAX reference for validation
# ---------------------------------------------------------------------------
def init_params(key, n_node, n_neigh, n_edge, time_dim, d):
    keys = jax.random.split(key, 8)

    def linear(k, fan_in, fan_out):
        bound = 1.0 / math.sqrt(fan_in)
        kw, kb = jax.random.split(k)
        # stored pre-transposed: [fan_in, fan_out]
        w = jax.random.uniform(kw, (fan_in, fan_out), jnp.float32, -bound, bound)
        b = jax.random.uniform(kb, (1, fan_out), jnp.float32, -bound, bound)
        return w, b

    p = {}
    p["wn"], p["bn"] = linear(keys[0], n_node, d)      # node_transform
    p["wnb"], p["bnb"] = linear(keys[1], n_neigh, d)   # neighbor_transform
    p["we"], p["be"] = linear(keys[2], n_edge, d)      # edge_transform
    p["wt"], p["bt"] = linear(keys[3], time_dim, d)    # time_transform
    p["wq"], p["bq"] = linear(keys[4], d, d)           # MHA in_proj (q)
    p["wk"], p["bk"] = linear(keys[5], d, d)           # MHA in_proj (k)
    p["wv"], p["bv"] = linear(keys[6], d, d)           # MHA in_proj (v)
    p["wo"], p["bo"] = linear(keys[7], d, d)           # MHA out_proj
    p["g1"] = jnp.ones((1, d), jnp.float32)            # LayerNorm1
    p["b1"] = jnp.zeros((1, d), jnp.float32)
    p["g2"] = jnp.ones((1, d), jnp.float32)            # LayerNorm2
    p["b2"] = jnp.zeros((1, d), jnp.float32)
    # sequence_transform is defined in __init__ but unused in forward -> omitted.
    return p


def _reference_forward(src_node, src_time, neighbor, edge_time, edge, params,
                       n_head):
    del src_time  # dead code in the reference forward (2-D path)
    D = params["wn"].shape[1]
    hd = D // n_head
    node_h = src_node @ params["wn"] + params["bn"]
    neighbor_h = neighbor @ params["wnb"] + params["bnb"]
    edge_h = edge @ params["we"] + params["be"]
    edge_time_h = edge_time @ params["wt"] + params["bt"]
    combined = (neighbor_h + edge_h + edge_time_h) / 3.0
    q = (node_h @ params["wq"] + params["bq"]) / math.sqrt(hd)
    k = combined @ params["wk"] + params["bk"]
    v = combined @ params["wv"] + params["bv"]
    B, S, _ = combined.shape
    qh = q.reshape(B, n_head, hd)
    kh = k.reshape(B, S, n_head, hd)
    vh = v.reshape(B, S, n_head, hd)
    scores = jnp.einsum("bhd,bshd->bhs", qh, kh)
    p = jax.nn.softmax(scores, axis=-1)
    ctx = jnp.einsum("bhs,bshd->bhd", p, vh).reshape(B, D)
    attn_out = ctx @ params["wo"] + params["bo"]

    def ln(x, g, b, eps=1e-5):
        mu = x.mean(-1, keepdims=True)
        var = ((x - mu) ** 2).mean(-1, keepdims=True)
        return (x - mu) / jnp.sqrt(var + eps) * g + b

    out1 = ln(node_h + attn_out, params["g1"], params["b1"])
    out2 = ln(out1 + node_h, params["g2"], params["b2"])
    attn_w = p.mean(axis=1).reshape(B, 1, S)
    return out2, attn_w


if __name__ == "__main__":
    B, S = 2, 8
    n_node, n_neigh, n_edge, time_dim = 32, 24, 16, 20
    n_head = 2
    d = n_node  # output_dimension defaults to n_node_features

    key = jax.random.PRNGKey(0)
    k1, k2, k3, k4, k5, kp = jax.random.split(key, 6)
    src_node = jax.random.normal(k1, (B, n_node), jnp.float32)
    src_time = jax.random.normal(k2, (B, time_dim), jnp.float32)
    neighbor = jax.random.normal(k3, (B, S, n_neigh), jnp.float32)
    edge_time = jax.random.normal(k4, (B, S, time_dim), jnp.float32)
    edge = jax.random.normal(k5, (B, S, n_edge), jnp.float32)

    params = init_params(kp, n_node, n_neigh, n_edge, time_dim, d)
    # f32 here for close parity with the reference; pass dtype=jnp.bfloat16 to
    # halve streamed-DMA bytes and run all five matmuls (incl. the head-mask
    # matmul) at native bf16 MXU rate on v6e/v7x (softmax/LN stay f32).
    packed = pack_params(params, n_head=n_head, dtype=jnp.float32)

    out, attn_w = temporal_attention_forward(
        src_node, src_time, neighbor, edge_time, edge, packed)
    jax.block_until_ready((out, attn_w))

    assert out.shape == (B, d)
    assert attn_w.shape == (B, 1, S)
    assert bool(jnp.all(jnp.isfinite(out)))
    assert bool(jnp.all(jnp.isfinite(attn_w)))

    out_ref, attn_ref = _reference_forward(
        src_node, src_time, neighbor, edge_time, edge, params, n_head)
    assert bool(jnp.allclose(out, out_ref, atol=5e-2, rtol=5e-2))
    assert bool(jnp.allclose(attn_w, attn_ref, atol=5e-2, rtol=5e-2))

    print("KERNEL_OK")
</pallas_src>

<mosaic_0001>
module attributes {stable_mosaic.version = 11 : i64} {
  func.func @kernel(%arg0: i32, %arg1: memref<8x32xf32, #tpu.memory_space<vmem>>, %arg2: memref<8x8x128xf32, #tpu.memory_space<vmem>>, %arg3: memref<32x128xf32, #tpu.memory_space<vmem>>, %arg4: memref<128x128xf32, #tpu.memory_space<vmem>>, %arg5: memref<5x128x128xf32, #tpu.memory_space<vmem>>, %arg6: memref<16x128xf32, #tpu.memory_space<vmem>>, %arg7: memref<8x128xf32, #tpu.memory_space<vmem>>, %arg8: memref<8x128xf32, #tpu.memory_space<vmem>>) attributes {dimension_semantics = [#tpu.dimension_semantics<parallel>], iteration_bounds = array<i64: 1>, scalar_prefetch = 0 : i64, scratch_operands = 0 : i64, tpu.core_type = #tpu.core_type<tc>, window_params = [{transform_indices = @transform_0, window_bounds = array<i64: 8, 32>}, {transform_indices = @transform_1, window_bounds = array<i64: 8, 8, 128>}, {pipeline_mode = #tpu.pipeline_mode<synchronous>, transform_indices = @transform_2, window_bounds = array<i64: 32, 128>}, {pipeline_mode = #tpu.pipeline_mode<synchronous>, transform_indices = @transform_3, window_bounds = array<i64: 128, 128>}, {pipeline_mode = #tpu.pipeline_mode<synchronous>, transform_indices = @transform_4, window_bounds = array<i64: 5, 128, 128>}, {pipeline_mode = #tpu.pipeline_mode<synchronous>, transform_indices = @transform_5, window_bounds = array<i64: 16, 128>}, {transform_indices = @transform_6, window_bounds = array<i64: 8, 128>}, {transform_indices = @transform_7, window_bounds = array<i64: 8, 128>}]} {
    %c0 = arith.constant 0 : index
    %c0_0 = arith.constant 0 : index
    %0 = vector.load %arg1[%c0, %c0_0] : memref<8x32xf32, #tpu.memory_space<vmem>>, vector<8x32xf32>
    %c0_1 = arith.constant 0 : index
    %c0_2 = arith.constant 0 : index
    %c0_3 = arith.constant 0 : index
    %1 = vector.load %arg2[%c0_1, %c0_2, %c0_3] : memref<8x8x128xf32, #tpu.memory_space<vmem>>, vector<8x8x128xf32>
    %c0_4 = arith.constant 0 : index
    %c0_5 = arith.constant 0 : index
    %2 = vector.load %arg3[%c0_4, %c0_5] : memref<32x128xf32, #tpu.memory_space<vmem>>, vector<32x128xf32>
    %c0_6 = arith.constant 0 : index
    %c0_7 = arith.constant 0 : index
    %3 = vector.load %arg4[%c0_6, %c0_7] : memref<128x128xf32, #tpu.memory_space<vmem>>, vector<128x128xf32>
    %c0_8 = arith.constant 0 : index
    %c0_9 = arith.constant 0 : index
    %c0_10 = arith.constant 0 : index
    %4 = vector.load %arg5[%c0_8, %c0_9, %c0_10] : memref<5x128x128xf32, #tpu.memory_space<vmem>>, vector<1x128x128xf32>
    %5 = vector.shape_cast %4 : vector<1x128x128xf32> to vector<128x128xf32>
    %c1 = arith.constant 1 : index
    %c0_11 = arith.constant 0 : index
    %c0_12 = arith.constant 0 : index
    %6 = vector.load %arg5[%c1, %c0_11, %c0_12] : memref<5x128x128xf32, #tpu.memory_space<vmem>>, vector<1x128x128xf32>
    %7 = vector.shape_cast %6 : vector<1x128x128xf32> to vector<128x128xf32>
    %c2 = arith.constant 2 : index
    %c0_13 = arith.constant 0 : index
    %c0_14 = arith.constant 0 : index
    %8 = vector.load %arg5[%c2, %c0_13, %c0_14] : memref<5x128x128xf32, #tpu.memory_space<vmem>>, vector<1x128x128xf32>
    %9 = vector.shape_cast %8 : vector<1x128x128xf32> to vector<128x128xf32>
    %c3 = arith.constant 3 : index
    %c0_15 = arith.constant 0 : index
    %c0_16 = arith.constant 0 : index
    %10 = vector.load %arg5[%c3, %c0_15, %c0_16] : memref<5x128x128xf32, #tpu.memory_space<vmem>>, vector<1x128x128xf32>
    %11 = vector.shape_cast %10 : vector<1x128x128xf32> to vector<128x128xf32>
    %c4 = arith.constant 4 : index
    %c0_17 = arith.constant 0 : index
    %c0_18 = arith.constant 0 : index
    %12 = vector.load %arg5[%c4, %c0_17, %c0_18] : memref<5x128x128xf32, #tpu.memory_space<vmem>>, vector<1x128x128xf32>
    %13 = vector.shape_cast %12 : vector<1x128x128xf32> to vector<128x128xf32>
    %c0_19 = arith.constant 0 : index
    %c0_20 = arith.constant 0 : index
    %14 = vector.load %arg6[%c0_19, %c0_20] : memref<16x128xf32, #tpu.memory_space<vmem>>, vector<16x128xf32>
    %15 = vector.extract_strided_slice %14 {offsets = [0, 0], sizes = [1, 128], strides = [1, 1]} : vector<16x128xf32> to vector<1x128xf32>
    %16 = vector.extract_strided_slice %14 {offsets = [1, 0], sizes = [1, 128], strides = [1, 1]} : vector<16x128xf32> to vector<1x128xf32>
    %17 = vector.extract_strided_slice %14 {offsets = [2, 0], sizes = [1, 128], strides = [1, 1]} : vector<16x128xf32> to vector<1x128xf32>
    %18 = vector.extract_strided_slice %14 {offsets = [3, 0], sizes = [1, 128], strides = [1, 1]} : vector<16x128xf32> to vector<1x128xf32>
    %19 = vector.extract_strided_slice %14 {offsets = [4, 0], sizes = [1, 128], strides = [1, 1]} : vector<16x128xf32> to vector<1x128xf32>
    %20 = vector.extract_strided_slice %14 {offsets = [5, 0], sizes = [1, 128], strides = [1, 1]} : vector<16x128xf32> to vector<1x128xf32>
    %21 = vector.extract_strided_slice %14 {offsets = [6, 0], sizes = [1, 128], strides = [1, 1]} : vector<16x128xf32> to vector<1x128xf32>
    %22 = vector.extract_strided_slice %14 {offsets = [7, 0], sizes = [1, 128], strides = [1, 1]} : vector<16x128xf32> to vector<1x128xf32>
    %23 = vector.extract_strided_slice %14 {offsets = [8, 0], sizes = [1, 128], strides = [1, 1]} : vector<16x128xf32> to vector<1x128xf32>
    %24 = vector.extract_strided_slice %14 {offsets = [9, 0], sizes = [1, 128], strides = [1, 1]} : vector<16x128xf32> to vector<1x128xf32>
    %cst = arith.constant dense<0.000000e+00> : vector<8x128xf32>
    %25 = tpu.matmul %0, %2, %cst {dimension_numbers = #tpu.dot_dimension_numbers<[1], [0], [0], [1], [0, 0, 1, 1], [], []>} : vector<8x32xf32>, vector<32x128xf32>, vector<8x128xf32> -> vector<8x128xf32>
    %26 = vector.broadcast %15 : vector<1x128xf32> to vector<8x128xf32>
    %27 = arith.addf %25, %26 : vector<8x128xf32>
    %28 = vector.shape_cast %1 : vector<8x8x128xf32> to vector<64x128xf32>
    %cst_21 = arith.constant dense<0.000000e+00> : vector<64x128xf32>
    %29 = tpu.matmul %28, %3, %cst_21 {dimension_numbers = #tpu.dot_dimension_numbers<[1], [0], [0], [1], [0, 0, 1, 1], [], []>} : vector<64x128xf32>, vector<128x128xf32>, vector<64x128xf32> -> vector<64x128xf32>
    %30 = vector.broadcast %16 : vector<1x128xf32> to vector<64x128xf32>
    %31 = arith.addf %29, %30 : vector<64x128xf32>
    %cst_22 = arith.constant dense<0.000000e+00> : vector<8x128xf32>
    %32 = tpu.matmul %27, %5, %cst_22 {dimension_numbers = #tpu.dot_dimension_numbers<[1], [0], [0], [1], [0, 0, 1, 1], [], []>} : vector<8x128xf32>, vector<128x128xf32>, vector<8x128xf32> -> vector<8x128xf32>
    %33 = vector.broadcast %17 : vector<1x128xf32> to vector<8x128xf32>
    %34 = arith.addf %32, %33 : vector<8x128xf32>
    %cst_23 = arith.constant dense<0.000000e+00> : vector<64x128xf32>
    %35 = tpu.matmul %31, %7, %cst_23 {dimension_numbers = #tpu.dot_dimension_numbers<[1], [0], [0], [1], [0, 0, 1, 1], [], []>} : vector<64x128xf32>, vector<128x128xf32>, vector<64x128xf32> -> vector<64x128xf32>
    %36 = vector.broadcast %18 : vector<1x128xf32> to vector<64x128xf32>
    %37 = arith.addf %35, %36 : vector<64x128xf32>
    %38 = vector.shape_cast %37 : vector<64x128xf32> to vector<8x8x128xf32>
    %cst_24 = arith.constant dense<0.000000e+00> : vector<64x128xf32>
    %39 = tpu.matmul %31, %9, %cst_24 {dimension_numbers = #tpu.dot_dimension_numbers<[1], [0], [0], [1], [0, 0, 1, 1], [], []>} : vector<64x128xf32>, vector<128x128xf32>, vector<64x128xf32> -> vector<64x128xf32>
    %40 = vector.broadcast %19 : vector<1x128xf32> to vector<64x128xf32>
    %41 = arith.addf %39, %40 : vector<64x128xf32>
    %42 = vector.shape_cast %41 : vector<64x128xf32> to vector<8x8x128xf32>
    %43 = vector.shape_cast %34 : vector<8x128xf32> to vector<8x1x128xf32>
    %44 = vector.broadcast %43 : vector<8x1x128xf32> to vector<8x8x128xf32>
    %45 = arith.mulf %44, %38 : vector<8x8x128xf32>
    %46 = vector.shape_cast %45 : vector<8x8x128xf32> to vector<64x128xf32>
    %cst_25 = arith.constant dense<0.000000e+00> : vector<64x128xf32>
    %47 = tpu.matmul %46, %13, %cst_25 {dimension_numbers = #tpu.dot_dimension_numbers<[1], [0], [0], [1], [0, 0, 1, 1], [], []>} : vector<64x128xf32>, vector<128x128xf32>, vector<64x128xf32> -> vector<64x128xf32>
    %48 = vector.shape_cast %47 : vector<64x128xf32> to vector<8x8x128xf32>
    %cst_26 = arith.constant dense<0xFF800000> : vector<8x128xf32>
    %49 = vector.multi_reduction <maximumf>, %48, %cst_26 [1] : vector<8x8x128xf32> to vector<8x128xf32>
    %50 = vector.shape_cast %49 : vector<8x128xf32> to vector<8x1x128xf32>
    %51 = vector.broadcast %50 : vector<8x1x128xf32> to vector<8x8x128xf32>
    %52 = arith.subf %48, %51 : vector<8x8x128xf32>
    %53 = math.exp %52 : vector<8x8x128xf32>
    %cst_27 = arith.constant dense<0.000000e+00> : vector<8x128xf32>
    %54 = vector.multi_reduction <add>, %53, %cst_27 [1] : vector<8x8x128xf32> to vector<8x128xf32>
    %55 = vector.shape_cast %54 : vector<8x128xf32> to vector<8x1x128xf32>
    %56 = tpu.reciprocal %55 {approx = true} : vector<8x1x128xf32> -> vector<8x1x128xf32>
    %57 = vector.broadcast %56 : vector<8x1x128xf32> to vector<8x8x128xf32>
    %58 = arith.mulf %53, %57 : vector<8x8x128xf32>
    %59 = arith.mulf %58, %42 : vector<8x8x128xf32>
    %cst_28 = arith.constant dense<0.000000e+00> : vector<8x128xf32>
    %60 = vector.multi_reduction <add>, %59, %cst_28 [1] : vector<8x8x128xf32> to vector<8x128xf32>
    %cst_29 = arith.constant dense<0.000000e+00> : vector<8x128xf32>
    %61 = tpu.matmul %60, %11, %cst_29 {dimension_numbers = #tpu.dot_dimension_numbers<[1], [0], [0], [1], [0, 0, 1, 1], [], []>} : vector<8x128xf32>, vector<128x128xf32>, vector<8x128xf32> -> vector<8x128xf32>
    %62 = vector.broadcast %20 : vector<1x128xf32> to vector<8x128xf32>
    %63 = arith.addf %61, %62 : vector<8x128xf32>
    %64 = tpu.iota {dimensions = array<i32: 2>} : vector<1x1x128xi32>
    %c32_i32 = arith.constant 32 : i32
    %65 = vector.broadcast %c32_i32 : i32 to vector<1x1x128xi32>
    %66 = arith.cmpi slt, %64, %65 : vector<1x1x128xi32>
    %cst_30 = arith.constant 0.000000e+00 : f32
    %67 = vector.shape_cast %66 : vector<1x1x128xi1> to vector<1x1x128xi1>
    %68 = vector.broadcast %67 : vector<1x1x128xi1> to vector<8x8x128xi1>
    %69 = vector.broadcast %cst_30 : f32 to vector<8x8x128xf32>
    %70 = arith.select %68, %58, %69 : vector<8x8x128xi1>, vector<8x8x128xf32>
    %cst_31 = arith.constant dense<0.000000e+00> : vector<8x8xf32>
    %71 = vector.multi_reduction <add>, %70, %cst_31 [2] : vector<8x8x128xf32> to vector<8x8xf32>
    %cst_32 = arith.constant 3.125000e-02 : f32
    %72 = vector.broadcast %cst_32 : f32 to vector<8x8xf32>
    %73 = arith.mulf %71, %72 : vector<8x8xf32>
    %cst_33 = arith.constant 0.000000e+00 : f32
    %74 = vector.broadcast %cst_33 : f32 to vector<8x120xf32>
    %75 = tpu.concatenate %73, %74 in 1 : vector<8x8xf32>, vector<8x120xf32> -> vector<8x128xf32>
    %76 = arith.addf %27, %63 : vector<8x128xf32>
    %cst_34 = arith.constant dense<0.000000e+00> : vector<8xf32>
    %77 = vector.multi_reduction <add>, %76, %cst_34 [1] : vector<8x128xf32> to vector<8xf32>
    %78 = vector.shape_cast %77 : vector<8xf32> to vector<8x1xf32>
    %cst_35 = arith.constant 3.125000e-02 : f32
    %79 = vector.broadcast %cst_35 : f32 to vector<8x1xf32>
    %80 = arith.mulf %78, %79 : vector<8x1xf32>
    %81 = arith.mulf %76, %76 : vector<8x128xf32>
    %cst_36 = arith.constant dense<0.000000e+00> : vector<8xf32>
    %82 = vector.multi_reduction <add>, %81, %cst_36 [1] : vector<8x128xf32> to vector<8xf32>
    %83 = vector.shape_cast %82 : vector<8xf32> to vector<8x1xf32>
    %cst_37 = arith.constant 3.125000e-02 : f32
    %84 = vector.broadcast %cst_37 : f32 to vector<8x1xf32>
    %85 = arith.mulf %83, %84 : vector<8x1xf32>
    %86 = arith.mulf %80, %80 : vector<8x1xf32>
    %87 = arith.subf %85, %86 : vector<8x1xf32>
    %88 = vector.broadcast %80 : vector<8x1xf32> to vector<8x128xf32>
    %89 = arith.subf %76, %88 : vector<8x128xf32>
    %cst_38 = arith.constant 9.99999974E-6 : f32
    %90 = vector.broadcast %cst_38 : f32 to vector<8x1xf32>
    %91 = arith.addf %87, %90 : vector<8x1xf32>
    %92 = math.rsqrt %91 : vector<8x1xf32>
    %93 = vector.broadcast %92 : vector<8x1xf32> to vector<8x128xf32>
    %94 = arith.mulf %89, %93 : vector<8x128xf32>
    %95 = vector.broadcast %21 : vector<1x128xf32> to vector<8x128xf32>
    %96 = arith.mulf %94, %95 : vector<8x128xf32>
    %97 = vector.broadcast %22 : vector<1x128xf32> to vector<8x128xf32>
    %98 = arith.addf %96, %97 : vector<8x128xf32>
    %99 = arith.addf %98, %27 : vector<8x128xf32>
    %cst_39 = arith.constant dense<0.000000e+00> : vector<8xf32>
    %100 = vector.multi_reduction <add>, %99, %cst_39 [1] : vector<8x128xf32> to vector<8xf32>
    %101 = vector.shape_cast %100 : vector<8xf32> to vector<8x1xf32>
    %cst_40 = arith.constant 3.125000e-02 : f32
    %102 = vector.broadcast %cst_40 : f32 to vector<8x1xf32>
    %103 = arith.mulf %101, %102 : vector<8x1xf32>
    %104 = arith.mulf %99, %99 : vector<8x128xf32>
    %cst_41 = arith.constant dense<0.000000e+00> : vector<8xf32>
    %105 = vector.multi_reduction <add>, %104, %cst_41 [1] : vector<8x128xf32> to vector<8xf32>
    %106 = vector.shape_cast %105 : vector<8xf32> to vector<8x1xf32>
    %cst_42 = arith.constant 3.125000e-02 : f32
    %107 = vector.broadcast %cst_42 : f32 to vector<8x1xf32>
    %108 = arith.mulf %106, %107 : vector<8x1xf32>
    %109 = arith.mulf %103, %103 : vector<8x1xf32>
    %110 = arith.subf %108, %109 : vector<8x1xf32>
    %111 = vector.broadcast %103 : vector<8x1xf32> to vector<8x128xf32>
    %112 = arith.subf %99, %111 : vector<8x128xf32>
    %cst_43 = arith.constant 9.99999974E-6 : f32
    %113 = vector.broadcast %cst_43 : f32 to vector<8x1xf32>
    %114 = arith.addf %110, %113 : vector<8x1xf32>
    %115 = math.rsqrt %114 : vector<8x1xf32>
    %116 = vector.broadcast %115 : vector<8x1xf32> to vector<8x128xf32>
    %117 = arith.mulf %112, %116 : vector<8x128xf32>
    %118 = vector.broadcast %23 : vector<1x128xf32> to vector<8x128xf32>
    %119 = arith.mulf %117, %118 : vector<8x128xf32>
    %120 = vector.broadcast %24 : vector<1x128xf32> to vector<8x128xf32>
    %121 = arith.addf %119, %120 : vector<8x128xf32>
    %c0_44 = arith.constant 0 : index
    %c0_45 = arith.constant 0 : index
    %122 = vector.load %arg7[%c0_44, %c0_45] : memref<8x128xf32, #tpu.memory_space<vmem>>, vector<8x128xf32>
    tpu.vector_store %arg7[%c0_44, %c0_45], %121 {strides = array<i32>} : memref<8x128xf32, #tpu.memory_space<vmem>>, vector<8x128xf32>,
    %c0_46 = arith.constant 0 : index
    %c0_47 = arith.constant 0 : index
    %123 = vector.load %arg8[%c0_46, %c0_47] : memref<8x128xf32, #tpu.memory_space<vmem>>, vector<8x128xf32>
    tpu.vector_store %arg8[%c0_46, %c0_47], %75 {strides = array<i32>} : memref<8x128xf32, #tpu.memory_space<vmem>>, vector<8x128xf32>,
    return
  }
  func.func @transform_0(%arg0: i32) -> (i32, i32) {
    %c0_i32 = arith.constant 0 : i32
    %c0_i32_0 = arith.constant 0 : i32
    return %arg0, %c0_i32 : i32, i32
  }
  func.func @transform_1(%arg0: i32) -> (i32, i32, i32) {
    %c0_i32 = arith.constant 0 : i32
    %c0_i32_0 = arith.constant 0 : i32
    %c0_i32_1 = arith.constant 0 : i32
    return %arg0, %c0_i32, %c0_i32_0 : i32, i32, i32
  }
  func.func @transform_2(%arg0: i32) -> (i32, i32) {
    %c0_i32 = arith.constant 0 : i32
    %c0_i32_0 = arith.constant 0 : i32
    %c0_i32_1 = arith.constant 0 : i32
    return %c0_i32, %c0_i32_0 : i32, i32
  }
  func.func @transform_3(%arg0: i32) -> (i32, i32) {
    %c0_i32 = arith.constant 0 : i32
    %c0_i32_0 = arith.constant 0 : i32
    %c0_i32_1 = arith.constant 0 : i32
    return %c0_i32, %c0_i32_0 : i32, i32
  }
  func.func @transform_4(%arg0: i32) -> (i32, i32, i32) {
    %c0_i32 = arith.constant 0 : i32
    %c0_i32_0 = arith.constant 0 : i32
    %c0_i32_1 = arith.constant 0 : i32
    %c0_i32_2 = arith.constant 0 : i32
    return %c0_i32, %c0_i32_0, %c0_i32_1 : i32, i32, i32
  }
  func.func @transform_5(%arg0: i32) -> (i32, i32) {
    %c0_i32 = arith.constant 0 : i32
    %c0_i32_0 = arith.constant 0 : i32
    %c0_i32_1 = arith.constant 0 : i32
    return %c0_i32, %c0_i32_0 : i32, i32
  }
  func.func @transform_6(%arg0: i32) -> (i32, i32) {
    %c0_i32 = arith.constant 0 : i32
    %c0_i32_0 = arith.constant 0 : i32
    return %arg0, %c0_i32 : i32, i32
  }
  func.func @transform_7(%arg0: i32) -> (i32, i32) {
    %c0_i32 = arith.constant 0 : i32
    %c0_i32_0 = arith.constant 0 : i32
    return %arg0, %c0_i32 : i32, i32
  }
}

</mosaic_0001>

<bundles_post_ra>
// kernel: tpu_custom_call.1
= control target key start
LH: loop header
LB: loop body
LE: loop exit
PB: predicated region body
PF: predicated region fallthrough
CT: control target
= control target key end

     0   :  { %13 = vsyncpa [#allocation3], 0  ;;  %s2260_s0 = inlined_call_operand.hbm [shape: f32[8,32], index: 0, kind: input, shape index: {}]   ;;  %s2261_s1 = inlined_call_operand.hbm [shape: f32[8,8,128], index: 1, kind: input, shape index: {}]   ;;  %s2262_s2 = inlined_call_operand.hbm [shape: f32[32,128], index: 2, kind: input, shape index: {}]   ;;  %s2263_s3 = inlined_call_operand.hbm [shape: f32[128,128], index: 3, kind: input, shape index: {}]   ;;  %s2264_s4 = inlined_call_operand.hbm [shape: f32[5,128,128], index: 4, kind: input, shape index: {}]   ;;  %s2265_s5 = inlined_call_operand.hbm [shape: f32[16,128], index: 5, kind: input, shape index: {}]   ;;  %s2266_s6 = inlined_call_operand.hbm [shape: f32[8,128], index: 6, kind: output, shape index: {0}]   ;;  %s2267_s7 = inlined_call_operand.hbm [shape: f32[8,128], index: 7, kind: output, shape index: {1}]  }
   0x1   :  { %14 = vsyncpa [#allocation6], 0 }
   0x2   :  { %15 = vsyncpa [#allocation9], 0 }
   0x3   :  { %16 = vsyncpa [#allocation12], 0 }
   0x4   :  { %17 = vsyncpa [#allocation4], 0 }
   0x5   :  { %18 = vsyncpa [#allocation15], 0  ;;  %s1977_s24 = smov [#allocation5]  }
   0x6   :  { %s34_s25 = sshll.u32 %s1977_s24, 4  ;;  %s35_s25 = int_to_ptr.vmem [resolvable:$true] %s34_s25 }
   0x7   :  { %s1813_s26 = scalar_lea.vmem %s35_s25, 1024  ;;  %p1818_p1 = scmp.lt.s32.totalorder %s35_s25, %s35_s25 }
   0x8   :  { %p1814_p0 = scmp.ne.s32.totalorder %s35_s25, %s1813_s26  ;;  %p1819_p2 = scmp.lt.s32.totalorder %s1813_s26, %s1813_s26 }
   0xa   :  { %p1820_p3 = por %p1819_p2, %p1818_p1 }
   0xc   :  { %p1821_p4 = pnand %p1820_p3, %p1814_p0 }
   0xe   :  { %1824 = shalt.err (!%p1821_p4)
}
   0xf   :  { %s1978_s27 = smov 128   ;;  %s1979_s28 = smov 8  }
  0x10   :  { %40 = dma.hbm_to_vmem [thread:$0]  %s2261_s1, 1024, %s35_s25, [#allocation6], %s1978_s27, %s1978_s27, %s1979_s28  }
  0x11   :  { %s1980_s8 = smov [#allocation8]   ;;  %s1981_s10 = smov [#allocation2]  }
  0x12   :  { %s58_s9 = sshll.u32 %s1980_s8, 4  ;;  %s25_s11 = sshll.u32 %s1981_s10, 4  ;;  %s59_s9 = int_to_ptr.vmem [resolvable:$true] %s58_s9  ;;  %s26_s11 = int_to_ptr.vmem [resolvable:$true] %s25_s11 }
  0x13   :  { %s1833_s12 = scalar_lea.vmem %s59_s9, 2048  ;;  %p1838_p6 = scmp.lt.s32.totalorder %s59_s9, %s59_s9 }
  0x14   :  { %p1834_p5 = scmp.ne.s32.totalorder %s59_s9, %s1833_s12  ;;  %p1839_p7 = scmp.lt.s32.totalorder %s1833_s12, %s1833_s12 }
  0x16   :  { %p1840_p8 = por %p1839_p7, %p1838_p6 }
  0x18   :  { %p1841_p9 = pnand %p1840_p8, %p1834_p5 }
  0x1a   :  { %1844 = shalt.err (!%p1841_p9)
}
  0x1b   :  { %64 = dma.hbm_to_vmem [thread:$0]  %s2263_s3, 2048, %s59_s9, [#allocation9], %s1978_s27, %s1978_s27, %s1979_s28  }
  0x1c   :  { %s1853_s1 = scalar_lea.vmem %s26_s11, 128  ;;  %p1858_p11 = scmp.lt.s32.totalorder %s26_s11, %s26_s11 }
  0x1d   :  { %p1854_p10 = scmp.ne.s32.totalorder %s26_s11, %s1853_s1  ;;  %p1859_p12 = scmp.lt.s32.totalorder %s1853_s1, %s1853_s1 }
  0x1f   :  { %p1860_p13 = por %p1859_p12, %p1858_p11 }
  0x21   :  { %p1861_p0 = pnand %p1860_p13, %p1854_p10 }
  0x23   :  { %1864 = shalt.err (!%p1861_p0)
}
  0x24   :  { %28 = dma.hbm_to_vmem [thread:$0]  %s2260_s0, 128, %s26_s11, [#allocation3]  }
  0x25   :  { %s1982_s17 = smov [#allocation7]   ;;  %s1983_s19 = smov [#allocation10]  }
  0x26   :  { %s46_s18 = sshll.u32 %s1982_s17, 4  ;;  %s70_s20 = sshll.u32 %s1983_s19, 4  ;;  %s47_s18 = int_to_ptr.vmem [resolvable:$true] %s46_s18  ;;  %s71_s20 = int_to_ptr.vmem [resolvable:$true] %s70_s20 }
  0x27   :  { %s1873_s21 = scalar_lea.vmem %s47_s18, 512  ;;  %p1878_p2 = scmp.lt.s32.totalorder %s47_s18, %s47_s18 }
  0x28   :  { %p1874_p1 = scmp.ne.s32.totalorder %s47_s18, %s1873_s21  ;;  %p1879_p3 = scmp.lt.s32.totalorder %s1873_s21, %s1873_s21 }
  0x2a   :  { %p1880_p4 = por %p1879_p3, %p1878_p2 }
  0x2c   :  { %p1881_p5 = pnand %p1880_p4, %p1874_p1 }
  0x2e   :  { %1884 = shalt.err (!%p1881_p5)
}
  0x2f   :  { %52 = dma.hbm_to_vmem [thread:$0]  %s2262_s2, 512, %s47_s18, [#allocation6], %s1978_s27, %s1978_s27, %s1979_s28  }
  0x30   :  { %s1893_s0 = scalar_lea.vmem %s71_s20, 10240  ;;  %p1898_p7 = scmp.lt.s32.totalorder %s71_s20, %s71_s20 }
  0x31   :  { %p1894_p6 = scmp.ne.s32.totalorder %s71_s20, %s1893_s0  ;;  %p1899_p8 = scmp.lt.s32.totalorder %s1893_s0, %s1893_s0 }
  0x33   :  { %p1900_p9 = por %p1899_p8, %p1898_p7 }
  0x35   :  { %p1901_p10 = pnand %p1900_p9, %p1894_p6 }
  0x37   :  { %1904 = shalt.err (!%p1901_p10)
}
  0x38   :  { %76 = dma.hbm_to_vmem [thread:$0]  %s2264_s4, 10240, %s71_s20, [#allocation9], %s1978_s27, %s1978_s27, %s1979_s28  }
  0x39   :  { %s1984_s25 = smov [#allocation11]  }
  0x3a   :  { %s82_s26 = sshll.u32 %s1984_s25, 4  ;;  %s83_s26 = int_to_ptr.vmem [resolvable:$true] %s82_s26 }
  0x3b   :  { %s1913_s29 = scalar_lea.vmem %s83_s26, 256  ;;  %p1918_p12 = scmp.lt.s32.totalorder %s83_s26, %s83_s26 }
  0x3c   :  { %p1914_p11 = scmp.ne.s32.totalorder %s83_s26, %s1913_s29  ;;  %p1919_p13 = scmp.lt.s32.totalorder %s1913_s29, %s1913_s29 }
  0x3e   :  { %p1920_p0 = por %p1919_p13, %p1918_p12 }
  0x40   :  { %p1921_p1 = pnand %p1920_p0, %p1914_p11 }
  0x42   :  { %1924 = shalt.err (!%p1921_p1)
}
  0x43   :  { %88 = dma.hbm_to_vmem [thread:$0]  %s2265_s5, 256, %s83_s26, [#allocation12], %s1978_s27, %s1978_s27, %s1979_s28  }
  0x44   :  { %1965 = dma.done.wait [#allocation3], 128  }
  0x45   :  { %1966 = vsyncadd [#allocation3], 4294967168 }
  0x46   :  { %1967 = dma.done.wait [#allocation6], 1536  }
  0x47   :  { %1968 = vsyncadd [#allocation6], 4294965760 }
  0x48   :  { %1969 = dma.done.wait [#allocation9], 12288  }
  0x49   :  { %1970 = vsyncadd [#allocation9], 4294955008 }
  0x4a   :  { %1971 = dma.done.wait [#allocation12], 256  }
  0x4b   :  { %1972 = vsyncadd [#allocation12], 4294967040  ;;  %v1985_v0 = vmov 0.0   ;;  %vm1986_vm0 = vmmov 0   ;;  %v119_v1 = vld [vmem:[#allocation7 + $0x18] sm:$0xff]  ;;  %v118_v3 = vld [vmem:[#allocation7 + $0x10] sm:$0xff] }
  0x4c   :  { %1498 = vmatprep.subr.mxu0 %v1985_v0  ;;  %1506 = vmatprep.mubr.msk.f32.mxu0 %vm1986_vm0, %v1985_v0  ;;  %v135_v2 = vld [vmem:[#allocation8 + $0x78] sm:$0xff]  ;;  %v134_v4 = vld [vmem:[#allocation8 + $0x70] sm:$0xff]  ;;  %v117_v5 = vld [vmem:[#allocation7 + $0x8] sm:$0xff]  ;;  %vm226_vm1 = vcmask 261120   ;;  %vm1108_vm3 = vcmask 1041409   ;;  %vm1110_vm4 = vcmask 1042434  }
  0x4d   :  { %1499 = vmatpush3.msra.mxu0 %v119_v1  ;;  %1509 = vmatprep.subr.mxu1 %v135_v2  ;;  %v133_v6 = vld [vmem:[#allocation8 + $0x68] sm:$0xff]  ;;  %v116_v7 = vld [vmem:[#allocation7] sm:$0xff]  ;;  %v107_v9 = vld [vmem:[#allocation2] sm:$0xff]  ;;  %v222_v1 = vlaneseq  ;;  %vm1112_vm5 = vcmask 1043459   ;;  %vm1114_vm6 = vcmask 1044484   ;;  %vm1116_vm7 = vcmask 1045509  }
  0x4e   :  { %1500 = vmatprep.subr.mxu0 %v1985_v0  ;;  %1510 = vmatpush3.msra.mxu1 %v135_v2  ;;  %v132_v8 = vld [vmem:[#allocation8 + $0x60] sm:$0xff]  ;;  %v131_v10 = vld [vmem:[#allocation8 + $0x58] sm:$0xff]  ;;  %v130_v12 = vld [vmem:[#allocation8 + $0x50] sm:$0xff]  ;;  %vm1118_vm8 = vcmask 1046534   ;;  %vm1120_vm9 = vcmask 1047559   ;;  %s1988_s4 = smov [#allocation14]  }
  0x4f   :  { %1501 = vmatpush3.msra.mxu0 %v118_v3  ;;  %1511 = vmatprep.subr.mxu1 %v134_v4  ;;  %v108_v11 = vld [vmem:[#allocation5] sm:$0xff]  ;;  %v151_v13 = vld [vmem:[#allocation10 + $0x78] sm:$0xff]  ;;  %v129_v14 = vld [vmem:[#allocation8 + $0x48] sm:$0xff]  ;;  %v2091_v2 = vshrl.u32 %v222_v1, 7  ;;  %s1346_s5 = sshll.u32 %s1988_s4, 4  ;;  %vm1278_vm10 = vcmask 64512   ;;  %s1347_s5 = int_to_ptr.vmem [resolvable:$true] %s1346_s5 }
  0x50   :  { %1502 = vmatprep.subr.mxu0 %v1985_v0  ;;  %1512 = vmatpush3.msra.mxu1 %v134_v4  ;;  %v150_v15 = vld [vmem:[#allocation10 + $0x70] sm:$0xff]  ;;  %v128_v16 = vld [vmem:[#allocation8 + $0x40] sm:$0xff]  ;;  %v149_v17 = vld [vmem:[#allocation10 + $0x68] sm:$0xff]  ;;  %s1989_s27 = smov [#allocation13]   ;;  %s1925_s8 = scalar_lea.vmem %s1347_s5, 128 }
  0x51   :  { %1503 = vmatpush3.msra.mxu0 %v117_v5  ;;  %1513 = vmatprep.subr.mxu1 %v133_v6  ;;  %v127_v18 = vld [vmem:[#allocation8 + $0x38] sm:$0xff]  ;;  %v148_v19 = vld [vmem:[#allocation10 + $0x60] sm:$0xff]  ;;  %v126_v20 = vld [vmem:[#allocation8 + $0x30] sm:$0xff]  ;;  %v2094_v3 = vsub.s32 0, %v2091_v2  ;;  %s1336_s28 = sshll.u32 %s1989_s27, 4  ;;  %p1926_p2 = scmp.ne.s32.totalorder %s1347_s5, %s1925_s8  ;;  %s1337_s28 = int_to_ptr.vmem [resolvable:$true] %s1336_s28 }
  0x52   :  { %1504 = vmatprep.subr.mxu0 %v1985_v0  ;;  %1514 = vmatpush3.msra.mxu1 %v133_v6  ;;  %v147_v21 = vld [vmem:[#allocation10 + $0x58] sm:$0xff]  ;;  %v125_v22 = vld [vmem:[#allocation8 + $0x28] sm:$0xff]  ;;  %v146_v23 = vld [vmem:[#allocation10 + $0x50] sm:$0xff]  ;;  %p1930_p3 = scmp.lt.s32.totalorder %s1347_s5, %s1347_s5  ;;  %p1931_p4 = scmp.lt.s32.totalorder %s1925_s8, %s1925_s8 }
  0x53   :  { %1505 = vmatpush3.msra.mxu0 %v116_v7  ;;  %1515 = vmatprep.subr.mxu1 %v132_v8  ;;  %v124_v24 = vld [vmem:[#allocation8 + $0x20] sm:$0xff]  ;;  %v145_v25 = vld [vmem:[#allocation10 + $0x48] sm:$0xff]  ;;  %v123_v26 = vld [vmem:[#allocation8 + $0x18] sm:$0xff] }
  0x54   :  { %1507 = vmatmul.mubr.msk.f32.vlgmr.msra.gmra.mxu0 %vm226_vm1, %v107_v9  ;;  %1516 = vmatpush3.msra.mxu1 %v132_v8  ;;  %v144_v27 = vld [vmem:[#allocation10 + $0x40] sm:$0xff]  ;;  %v122_v28 = vld [vmem:[#allocation8 + $0x10] sm:$0xff]  ;;  %v143_v29 = vld [vmem:[#allocation10 + $0x38] sm:$0xff]  ;;  %p1932_p5 = por %p1931_p4, %p1930_p3 }
  0x55   :  { %1517 = vmatprep.subr.mxu1 %v131_v10  ;;  %1541 = vmatprep.mubr.f32.mxu1 %v108_v11  ;;  %v121_v30 = vld [vmem:[#allocation8 + $0x8] sm:$0xff]  ;;  %v142_v31 = vld [vmem:[#allocation10 + $0x30] sm:$0xff]  ;;  %v120_v32 = vld [vmem:[#allocation8] sm:$0xff] }
  0x56   :  { %1518 = vmatpush3.msra.mxu1 %v131_v10  ;;  %1553 = vmatprep.subr.mxu0 %v1985_v0  ;;  %v141_v33 = vld [vmem:[#allocation10 + $0x28] sm:$0xff]  ;;  %v140_v35 = vld [vmem:[#allocation10 + $0x20] sm:$0xff]  ;;  %v110_v36 = vld [vmem:[#allocation5 + $0x10] sm:$0xff]  ;;  %p1933_p6 = pnand %p1932_p5, %p1926_p2 }
  0x57   :  { %1519 = vmatprep.subr.mxu1 %v130_v12  ;;  %1554 = vmatpush3.msra.mxu0 %v151_v13  ;;  %v109_v34 = vld [vmem:[#allocation5 + $0x8] sm:$0xff]  ;;  %v139_v37 = vld [vmem:[#allocation10 + $0x18] sm:$0xff]  ;;  %v138_v40 = vld [vmem:[#allocation10 + $0x10] sm:$0xff] }
  0x58   :  { %1520 = vmatpush3.msra.mxu1 %v130_v12  ;;  %1555 = vmatprep.subr.mxu0 %v1985_v0  ;;  %v168_v38 = vld [vmem:[#allocation10 + $0xf8] sm:$0xff]  ;;  %v112_v41 = vld [vmem:[#allocation5 + $0x20] sm:$0xff]  ;;  %v137_v42 = vld [vmem:[#allocation10 + $0x8] sm:$0xff] }
  0x59   :  { %1521 = vmatprep.subr.mxu1 %v129_v14  ;;  %1556 = vmatpush3.msra.mxu0 %v150_v15  ;;  %v111_v39 = vld [vmem:[#allocation5 + $0x18] sm:$0xff]  ;;  %v113_v43 = vld [vmem:[#allocation5 + $0x28] sm:$0xff]  ;;  %v114_v44 = vld [vmem:[#allocation5 + $0x30] sm:$0xff] }
  0x5a   :  { %1522 = vmatpush3.msra.mxu1 %v129_v14  ;;  %1557 = vmatprep.subr.mxu0 %v1985_v0  ;;  %v115_v45 = vld [vmem:[#allocation5 + $0x38] sm:$0xff]  ;;  %v136_v46 = vld [vmem:[#allocation10] sm:$0xff]  ;;  %v167_v47 = vld [vmem:[#allocation10 + $0xf0] sm:$0xff] }
  0x5b   :  { %1523 = vmatprep.subr.mxu1 %v128_v16  ;;  %1558 = vmatpush3.msra.mxu0 %v149_v17  ;;  %v185_v48 = vld [vmem:[#allocation10 + $0x178] sm:$0xff]  ;;  %v166_v49 = vld [vmem:[#allocation10 + $0xe8] sm:$0xff]  ;;  %v165_v50 = vld [vmem:[#allocation10 + $0xe0] sm:$0xff] }
  0x5c   :  { %1524 = vmatpush3.msra.mxu1 %v128_v16  ;;  %1559 = vmatprep.subr.mxu0 %v1985_v0  ;;  %v164_v51 = vld [vmem:[#allocation10 + $0xd8] sm:$0xff]  ;;  %v163_v52 = vld [vmem:[#allocation10 + $0xd0] sm:$0xff]  ;;  %v162_v53 = vld [vmem:[#allocation10 + $0xc8] sm:$0xff] }
  0x5d   :  { %1525 = vmatprep.subr.mxu1 %v127_v18  ;;  %1560 = vmatpush3.msra.mxu0 %v148_v19  ;;  %v161_v54 = vld [vmem:[#allocation10 + $0xc0] sm:$0xff]  ;;  %v160_v55 = vld [vmem:[#allocation10 + $0xb8] sm:$0xff]  ;;  %v159_v56 = vld [vmem:[#allocation10 + $0xb0] sm:$0xff] }
  0x5e   :  { %1526 = vmatpush3.msra.mxu1 %v127_v18  ;;  %1561 = vmatprep.subr.mxu0 %v1985_v0  ;;  %v158_v57 = vld [vmem:[#allocation10 + $0xa8] sm:$0xff]  ;;  %v157_v58 = vld [vmem:[#allocation10 + $0xa0] sm:$0xff]  ;;  %v156_v59 = vld [vmem:[#allocation10 + $0x98] sm:$0xff] }
  0x5f   :  { %1527 = vmatprep.subr.mxu1 %v126_v20  ;;  %1562 = vmatpush3.msra.mxu0 %v147_v21  ;;  %v155_v60 = vld [vmem:[#allocation10 + $0x90] sm:$0xff]  ;;  %v154_v61 = vld [vmem:[#allocation10 + $0x88] sm:$0xff]  ;;  %v153_v62 = vld [vmem:[#allocation10 + $0x80] sm:$0xff] }
  0x60   :  { %1528 = vmatpush3.msra.mxu1 %v126_v20  ;;  %1563 = vmatprep.subr.mxu0 %v1985_v0  ;;  %v2087_v63 = vld [vmem:[#allocation10 + $0x278] sm:$0xff]  ;;  %v2096_v4 = vld [vmem:[#allocation11] sm:$0xff]  ;;  %v184_v8 = vld [vmem:[#allocation10 + $0x170] sm:$0xff]  ;;  %v302_v20 = vsub.s32 1, %v2091_v2 }
  0x61   :  { %1529 = vmatprep.subr.mxu1 %v125_v22  ;;  %1564 = vmatpush3.msra.mxu0 %v146_v23  ;;  %v225_v5 = vrot.slane %v2096_v4, %v2094_v3  ;;  %v183_v10 = vld [vmem:[#allocation10 + $0x168] sm:$0xff]  ;;  %v182_v11 = vld [vmem:[#allocation10 + $0x160] sm:$0xff]  ;;  %v181_v12 = vld [vmem:[#allocation10 + $0x158] sm:$0xff] }
  0x62   :  { %1530 = vmatpush3.msra.mxu1 %v125_v22  ;;  %1565 = vmatprep.subr.mxu0 %v1985_v0  ;;  %v180_v13 = vld [vmem:[#allocation10 + $0x150] sm:$0xff]  ;;  %v179_v14 = vld [vmem:[#allocation10 + $0x148] sm:$0xff]  ;;  %v178_v15 = vld [vmem:[#allocation10 + $0x140] sm:$0xff]  ;;  %v303_v23 = vrot.slane %v2096_v4, %v302_v20 }
  0x63   :  { %1531 = vmatprep.subr.mxu1 %v124_v24  ;;  %1566 = vmatpush3.msra.mxu0 %v145_v25  ;;  %v177_v16 = vld [vmem:[#allocation10 + $0x138] sm:$0xff]  ;;  %v176_v17 = vld [vmem:[#allocation10 + $0x130] sm:$0xff]  ;;  %v175_v18 = vld [vmem:[#allocation10 + $0x128] sm:$0xff] }
  0x64   :  { %1532 = vmatpush3.msra.mxu1 %v124_v24  ;;  %1567 = vmatprep.subr.mxu0 %v1985_v0  ;;  %v174_v19 = vld [vmem:[#allocation10 + $0x120] sm:$0xff]  ;;  %v173_v21 = vld [vmem:[#allocation10 + $0x118] sm:$0xff]  ;;  %v172_v24 = vld [vmem:[#allocation10 + $0x110] sm:$0xff] }
  0x65   :  { %1533 = vmatprep.subr.mxu1 %v123_v26  ;;  %1568 = vmatpush3.msra.mxu0 %v144_v27  ;;  %v171_v27 = vld [vmem:[#allocation10 + $0x108] sm:$0xff] }
  0x66   :  { %1534 = vmatpush3.msra.mxu1 %v123_v26  ;;  %1569 = vmatprep.subr.mxu0 %v1985_v0 }
  0x67   :  { %1535 = vmatprep.subr.mxu1 %v122_v28  ;;  %1570 = vmatpush3.msra.mxu0 %v143_v29 }
  0x68   :  { %1536 = vmatpush3.msra.mxu1 %v122_v28  ;;  %1571 = vmatprep.subr.mxu0 %v1985_v0 }
  0x69   :  { %1537 = vmatprep.subr.mxu1 %v121_v30  ;;  %1572 = vmatpush3.msra.mxu0 %v142_v31 }
  0x6a   :  { %1538 = vmatpush3.msra.mxu1 %v121_v30  ;;  %1573 = vmatprep.subr.mxu0 %v1985_v0  ;;  %v170_v30 = vld [vmem:[#allocation10 + $0x100] sm:$0xff] }
  0x6b   :  { %1539 = vmatprep.subr.mxu1 %v120_v32  ;;  %1574 = vmatpush3.msra.mxu0 %v141_v33  ;;  %v218_v33 = vld [vmem:[#allocation10 + $0x270] sm:$0xff] }
  0x6c   :  { %1540 = vmatpush3.msra.mxu1 %v120_v32  ;;  %1575 = vmatprep.subr.mxu0 %v1985_v0 }
  0x6d   :  { %1542 = vmatmul.mubr.f32.vlgmr.msra.gmra.mxu1 %v109_v34  ;;  %1576 = vmatpush3.msra.mxu0 %v140_v35 }
  0x6e   :  { %1544 = vmatprep.mubr.f32.mxu1 %v110_v36  ;;  %1577 = vmatprep.subr.mxu0 %v1985_v0 }
  0x6f   :  { %1578 = vmatpush3.msra.mxu0 %v139_v37  ;;  %1588 = vmatprep.subr.mxu1 %v168_v38  ;;  %v217_v37 = vld [vmem:[#allocation10 + $0x268] sm:$0xff] }
  0x70   :  { %1579 = vmatprep.subr.mxu0 %v1985_v0  ;;  %1589 = vmatpush3.msra.mxu1 %v168_v38 }
  0x71   :  { %1545 = vmatmul.mubr.f32.gmra.mxu1 %v111_v39  ;;  %1580 = vmatpush3.msra.mxu0 %v138_v40 }
  0x72   :  { %1547 = vmatprep.mubr.f32.mxu1 %v112_v41  ;;  %1581 = vmatprep.subr.mxu0 %v1985_v0  ;;  %v216_v41 = vld [vmem:[#allocation10 + $0x260] sm:$0xff] }
  0x73   :  { %1582 = vmatpush3.msra.mxu0 %v137_v42  ;;  %1585 = vmatprep.mubr.msk.f32.mxu0 %vm1986_vm0, %v1985_v0 }
  0x74   :  { %1583 = vmatprep.subr.mxu0 %v1985_v0  ;;  %1590 = vmatprep.subr.mxu1 %v167_v47 }
  0x75   :  { %1548 = vmatmul.mubr.f32.gmra.mxu1 %v113_v43  ;;  %1584 = vmatpush3.msra.mxu0 %v136_v46  ;;  %v214_v46 = vld [vmem:[#allocation10 + $0x250] sm:$0xff] }
  0x76   :  { %1550 = vmatprep.mubr.f32.mxu1 %v114_v44  ;;  %1591 = vmatpush3.msra.mxu1 %v167_v47  ;;  %v215_v44 = vld [vmem:[#allocation10 + $0x258] sm:$0xff]  ;;  %v213_v47 = vld [vmem:[#allocation10 + $0x248] sm:$0xff] }
  0x77   :  { %1632 = vmatprep.subr.mxu0 %v185_v48  ;;  %1592 = vmatprep.subr.mxu1 %v166_v49 }
  0x78   :  { %1593 = vmatpush3.msra.mxu1 %v166_v49  ;;  %v211_v49 = vld [vmem:[#allocation10 + $0x238] sm:$0xff] }
  0x79   :  { %1551 = vmatmul.mubr.f32.gmra.mxu1 %v115_v45  ;;  %1594 = vmatprep.subr.mxu1 %v165_v50 }
  0x7a   :  { %1595 = vmatpush3.msra.mxu1 %v165_v50  ;;  %v210_v50 = vld [vmem:[#allocation10 + $0x230] sm:$0xff] }
  0x7b   :  { %1596 = vmatprep.subr.mxu1 %v164_v51 }
  0x7c   :  { %1597 = vmatpush3.msra.mxu1 %v164_v51  ;;  %v209_v51 = vld [vmem:[#allocation10 + $0x228] sm:$0xff] }
  0x7d   :  { %1598 = vmatprep.subr.mxu1 %v163_v52 }
  0x7e   :  { %1599 = vmatpush3.msra.mxu1 %v163_v52  ;;  %v208_v52 = vld [vmem:[#allocation10 + $0x220] sm:$0xff] }
  0x7f   :  { %1600 = vmatprep.subr.mxu1 %v162_v53 }
  0x80   :  { %1601 = vmatpush3.msra.mxu1 %v162_v53  ;;  %v207_v53 = vld [vmem:[#allocation10 + $0x218] sm:$0xff] }
  0x81   :  { %1602 = vmatprep.subr.mxu1 %v161_v54 }
  0x82   :  { %1603 = vmatpush3.msra.mxu1 %v161_v54  ;;  %v206_v54 = vld [vmem:[#allocation10 + $0x210] sm:$0xff] }
  0x83   :  { %1604 = vmatprep.subr.mxu1 %v160_v55 }
  0x84   :  { %1605 = vmatpush3.msra.mxu1 %v160_v55  ;;  %v205_v55 = vld [vmem:[#allocation10 + $0x208] sm:$0xff] }
  0x85   :  { %1606 = vmatprep.subr.mxu1 %v159_v56 }
  0x86   :  { %1607 = vmatpush3.msra.mxu1 %v159_v56  ;;  %v204_v56 = vld [vmem:[#allocation10 + $0x200] sm:$0xff] }
  0x87   :  { %1608 = vmatprep.subr.mxu1 %v158_v57 }
  0x88   :  { %1609 = vmatpush3.msra.mxu1 %v158_v57 }
  0x89   :  { %1610 = vmatprep.subr.mxu1 %v157_v58 }
  0x8a   :  { %1611 = vmatpush3.msra.mxu1 %v157_v58 }
  0x8b   :  { %1612 = vmatprep.subr.mxu1 %v156_v59 }
  0x8c   :  { %1613 = vmatpush3.msra.mxu1 %v156_v59  ;;  %v411_v59 = vsub.s32 2, %v2091_v2 }
  0x8d   :  { %1614 = vmatprep.subr.mxu1 %v155_v60 }
  0x8e   :  { %1615 = vmatpush3.msra.mxu1 %v155_v60  ;;  %v1987_v60 = vmov 1966171168  }
  0x8f   :  { %1616 = vmatprep.subr.mxu1 %v154_v61 }
  0x90   :  { %1617 = vmatpush3.msra.mxu1 %v154_v61  ;;  %v704_v61 = vunpack.c.l.s4 %v1987_v60  ;;  %v198_v60 = vld [vmem:[#allocation10 + $0x1d8] sm:$0xff] }
  0x91   :  { %1618 = vmatprep.subr.mxu1 %v153_v62 }
  0x92   :  { %1619 = vmatpush3.msra.mxu1 %v153_v62  ;;  %v412_v62 = vrot.slane %v2096_v4, %v411_v59  ;;  %v199_v59 = vld [vmem:[#allocation10 + $0x1e0] sm:$0xff] }
  0x93   :  { %1676 = vmatprep.subr.mxu1 %v2087_v63 }
 0x114   :  { %v296_v6 = vpop.f32.mrf.mxu0 }
 0x115   :  { %v2100_v7 = vadd.f32 %v296_v6, %v225_v5 }
 0x116   :  { %v1508_v9 = vpop.f32.mrf.mxu0 }
 0x117   :  { %1586 = vmatmul.mubr.f32.vlgmr.msra.gmra.mxu0 %v2100_v7 }
 0x118   :  { %1633 = vmatpush3.msra.mxu0 %v185_v48  ;;  %v212_v48 = vld [vmem:[#allocation10 + $0x240] sm:$0xff] }
 0x119   :  { %1634 = vmatprep.subr.mxu0 %v184_v8 }
 0x11a   :  { %1635 = vmatpush3.msra.mxu0 %v184_v8 }
 0x11b   :  { %1636 = vmatprep.subr.mxu0 %v183_v10 }
 0x11c   :  { %1637 = vmatpush3.msra.mxu0 %v183_v10  ;;  %v485_v10 = vsub.s32 3, %v2091_v2 }
 0x11d   :  { %1638 = vmatprep.subr.mxu0 %v182_v11 }
 0x11e   :  { %1639 = vmatpush3.msra.mxu0 %v182_v11 }
 0x11f   :  { %1640 = vmatprep.subr.mxu0 %v181_v12 }
 0x120   :  { %1641 = vmatpush3.msra.mxu0 %v181_v12 }
 0x121   :  { %1642 = vmatprep.subr.mxu0 %v180_v13 }
 0x122   :  { %1643 = vmatpush3.msra.mxu0 %v180_v13  ;;  %v486_v13 = vrot.slane %v2096_v4, %v485_v10  ;;  %v190_v10 = vld [vmem:[#allocation10 + $0x198] sm:$0xff] }
 0x123   :  { %1644 = vmatprep.subr.mxu0 %v179_v14 }
 0x124   :  { %1645 = vmatpush3.msra.mxu0 %v179_v14 }
 0x125   :  { %1646 = vmatprep.subr.mxu0 %v178_v15 }
 0x126   :  { %1647 = vmatpush3.msra.mxu0 %v178_v15 }
 0x127   :  { %1648 = vmatprep.subr.mxu0 %v177_v16 }
 0x128   :  { %1649 = vmatpush3.msra.mxu0 %v177_v16 }
 0x129   :  { %1650 = vmatprep.subr.mxu0 %v176_v17 }
 0x12a   :  { %1651 = vmatpush3.msra.mxu0 %v176_v17 }
 0x12b   :  { %1652 = vmatprep.subr.mxu0 %v175_v18 }
 0x12c   :  { %1653 = vmatpush3.msra.mxu0 %v175_v18 }
 0x12d   :  { %1654 = vmatprep.subr.mxu0 %v174_v19  ;;  %v1543_v22 = vpop.f32.mrf.mxu1 }
 0x12e   :  { %1655 = vmatpush3.msra.mxu0 %v174_v19  ;;  %v376_v29 = vadd.f32 %v1543_v22, %v303_v23 }
 0x12f   :  { %1656 = vmatprep.subr.mxu0 %v173_v21  ;;  %v370_v25 = vpop.f32.mrf.mxu1 }
 0x130   :  { %v371_v26 = vadd.f32 %v370_v25, %v303_v23  ;;  %1657 = vmatpush3.msra.mxu0 %v173_v21 }
 0x131   :  { %1658 = vmatprep.subr.mxu0 %v172_v24  ;;  %v1546_v28 = vpop.f32.mrf.mxu1 }
 0x132   :  { %1659 = vmatpush3.msra.mxu0 %v172_v24  ;;  %1620 = vmatprep.mubr.f32.mxu1 %v371_v26  ;;  %v386_v35 = vadd.f32 %v1546_v28, %v303_v23 }
 0x133   :  { %1660 = vmatprep.subr.mxu0 %v171_v27  ;;  %1664 = vmatprep.mubr.f32.mxu0 %v371_v26  ;;  %v380_v31 = vpop.f32.mrf.mxu1 }
 0x134   :  { %v381_v32 = vadd.f32 %v380_v31, %v303_v23  ;;  %1621 = vmatmul.mubr.f32.vlgmr.msra.gmra.mxu1 %v376_v29  ;;  %1661 = vmatpush3.msra.mxu0 %v171_v27 }
 0x135   :  { %1662 = vmatprep.subr.mxu0 %v170_v30  ;;  %v1549_v34 = vpop.f32.mrf.mxu1  ;;  %1677 = vmatpush3.msra.mxu1 %v2087_v63  ;;  %v705_v63 = vunpack.c.0.s8 %v704_v61  ;;  %v197_v61 = vld [vmem:[#allocation10 + $0x1d0] sm:$0xff] }
 0x136   :  { %1663 = vmatpush3.msra.mxu0 %v170_v30  ;;  %1623 = vmatprep.mubr.f32.mxu1 %v381_v32  ;;  %v396_v40 = vadd.f32 %v1549_v34, %v303_v23 }
 0x137   :  { %1665 = vmatmul.mubr.f32.vlgmr.msra.gmra.mxu0 %v376_v29  ;;  %v390_v36 = vpop.f32.mrf.mxu1  ;;  %1678 = vmatprep.subr.mxu1 %v218_v33  ;;  %v708_v6 = vsub.s32 %v705_v63, %v2091_v2  ;;  %v195_v63 = vld [vmem:[#allocation10 + $0x1c0] sm:$0xff] }
 0x138   :  { %v391_v38 = vadd.f32 %v390_v36, %v303_v23  ;;  %1624 = vmatmul.mubr.f32.gmra.mxu1 %v386_v35  ;;  %1667 = vmatprep.mubr.f32.mxu0 %v381_v32 }
 0x139   :  { %v1552_v39 = vpop.f32.mrf.mxu1  ;;  %1679 = vmatpush3.msra.mxu1 %v218_v33  ;;  %1720 = vmatprep.subr.mxu0 %v1985_v0 }
 0x13a   :  { %1626 = vmatprep.mubr.f32.mxu1 %v391_v38  ;;  %1680 = vmatprep.subr.mxu1 %v217_v37  ;;  %v406_v45 = vadd.f32 %v1552_v39, %v303_v23 }
 0x13b   :  { %1668 = vmatmul.mubr.f32.gmra.mxu0 %v386_v35  ;;  %v400_v42 = vpop.f32.mrf.mxu1  ;;  %1681 = vmatpush3.msra.mxu1 %v217_v37 }
 0x13c   :  { %v401_v43 = vadd.f32 %v400_v42, %v303_v23  ;;  %1627 = vmatmul.mubr.f32.gmra.mxu1 %v396_v40  ;;  %1670 = vmatprep.mubr.f32.mxu0 %v391_v38 }
 0x13d   :  { %1682 = vmatprep.subr.mxu1 %v216_v41 }
 0x13e   :  { %1629 = vmatprep.mubr.f32.mxu1 %v401_v43  ;;  %1683 = vmatpush3.msra.mxu1 %v216_v41 }
 0x13f   :  { %1671 = vmatmul.mubr.f32.gmra.mxu0 %v396_v40  ;;  %1684 = vmatprep.subr.mxu1 %v215_v44 }
 0x140   :  { %1630 = vmatmul.mubr.f32.gmra.mxu1 %v406_v45  ;;  %1673 = vmatprep.mubr.f32.mxu0 %v401_v43 }
 0x141   :  { %1685 = vmatpush3.msra.mxu1 %v215_v44 }
 0x142   :  { %1686 = vmatprep.subr.mxu1 %v214_v46 }
 0x143   :  { %1674 = vmatmul.mubr.f32.gmra.mxu0 %v406_v45  ;;  %1687 = vmatpush3.msra.mxu1 %v214_v46 }
 0x144   :  { %1688 = vmatprep.subr.mxu1 %v213_v47  ;;  %1752 = vmatprep.mubr.msk.f32.mxu0 %vm1986_vm0, %v1985_v0 }
 0x145   :  { %1689 = vmatpush3.msra.mxu1 %v213_v47 }
 0x146   :  { %1690 = vmatprep.subr.mxu1 %v212_v48 }
 0x147   :  { %1691 = vmatpush3.msra.mxu1 %v212_v48 }
 0x148   :  { %1692 = vmatprep.subr.mxu1 %v211_v49 }
 0x149   :  { %1693 = vmatpush3.msra.mxu1 %v211_v49 }
 0x14a   :  { %1694 = vmatprep.subr.mxu1 %v210_v50 }
 0x14b   :  { %1695 = vmatpush3.msra.mxu1 %v210_v50 }
 0x14c   :  { %1696 = vmatprep.subr.mxu1 %v209_v51 }
 0x14d   :  { %1697 = vmatpush3.msra.mxu1 %v209_v51 }
 0x14e   :  { %1698 = vmatprep.subr.mxu1 %v208_v52 }
 0x14f   :  { %1699 = vmatpush3.msra.mxu1 %v208_v52 }
 0x150   :  { %1700 = vmatprep.subr.mxu1 %v207_v53 }
 0x151   :  { %1701 = vmatpush3.msra.mxu1 %v207_v53 }
 0x152   :  { %1702 = vmatprep.subr.mxu1 %v206_v54 }
 0x153   :  { %1703 = vmatpush3.msra.mxu1 %v206_v54 }
 0x154   :  { %1704 = vmatprep.subr.mxu1 %v205_v55 }
 0x155   :  { %1705 = vmatpush3.msra.mxu1 %v205_v55 }
 0x156   :  { %1706 = vmatprep.subr.mxu1 %v204_v56 }
 0x157   :  { %1707 = vmatpush3.msra.mxu1 %v204_v56  ;;  %v202_v56 = vld [vmem:[#allocation10 + $0x1f8] sm:$0xff] }
 0x158   :  { %1721 = vmatpush3.msra.mxu0 %v202_v56 }
 0x159   :  { %1722 = vmatprep.subr.mxu0 %v1985_v0 }
 0x1d7   :  { %v479_v57 = vpop.f32.mrf.mxu0 }
 0x1d8   :  { %v480_v5 = vadd.f32 %v479_v57, %v412_v62  ;;  %v201_v57 = vld [vmem:[#allocation10 + $0x1f0] sm:$0xff]  ;;  %v196_v62 = vld [vmem:[#allocation10 + $0x1c8] sm:$0xff] }
 0x1d9   :  { %v1587_v58 = vpop.f32.mrf.mxu0  ;;  %1723 = vmatpush3.msra.mxu0 %v201_v57 }
 0x1da   :  { %v709_v8 = vrot.slane %v480_v5, %v708_v6  ;;  %v702_v11 = vcombine.high %v480_v5, %v480_v5  ;;  %v200_v58 = vld [vmem:[#allocation10 + $0x1e8] sm:$0xff]  ;;  %1724 = vmatprep.subr.mxu0 %v1985_v0  ;;  %v194_v5 = vld [vmem:[#allocation10 + $0x1b8] sm:$0xff] }
 0x1db   :  { %1725 = vmatpush3.msra.mxu0 %v200_v58 }
 0x1dc   :  { %v717_v9 = vcombine.high %v709_v8, %v709_v8  ;;  %v725_v12 = vrot.slane %v709_v8, %v708_v6  ;;  %v716_v15 = vrot.slane %v702_v11, %v708_v6  ;;  %1726 = vmatprep.subr.mxu0 %v1985_v0  ;;  %v192_v8 = vld [vmem:[#allocation10 + $0x1a8] sm:$0xff]  ;;  %v189_v11 = vld [vmem:[#allocation10 + $0x190] sm:$0xff] }
 0x1dd   :  { %1727 = vmatpush3.msra.mxu0 %v199_v59 }
 0x1de   :  { %v739_v14 = vrot.slane %v717_v9, %v708_v6  ;;  %v754_v17 = vrot.slane %v725_v12, %v2094_v3  ;;  %v747_v24 = vcombine.high %v725_v12, %v725_v12  ;;  %v718_v25 = vcombine.high %v716_v15, %v716_v15  ;;  %1728 = vmatprep.subr.mxu0 %v1985_v0  ;;  %v191_v9 = vld [vmem:[#allocation10 + $0x1a0] sm:$0xff]  ;;  %v188_v12 = vld [vmem:[#allocation10 + $0x188] sm:$0xff] }
 0x1df   :  { %v732_v34 = vrot.slane %v716_v15, %v708_v6  ;;  %1729 = vmatpush3.msra.mxu0 %v198_v60 }
 0x1e0   :  { %v758_v19 = vrot.slane %v739_v14, %v2094_v3  ;;  %v749_v22 = vcombine.high %v739_v14, %v739_v14  ;;  %v762_v33 = vrot.slane %v747_v24, %v2094_v3  ;;  %v746_v36 = vrot.slane %v718_v25, %v708_v6  ;;  %1730 = vmatprep.subr.mxu0 %v1985_v0  ;;  %v193_v6 = vld [vmem:[#allocation10 + $0x1b0] sm:$0xff] }
 0x1e1   :  { %v770_v42 = vrot.slane %v732_v34, %v2094_v3  ;;  %v748_v43 = vcombine.high %v732_v34, %v732_v34  ;;  %1731 = vmatpush3.msra.mxu0 %v197_v61 }
 0x1e2   :  { %v766_v30 = vrot.slane %v749_v22, %v2094_v3  ;;  %v774_v44 = vrot.slane %v746_v36, %v2094_v3  ;;  %v750_v46 = vcombine.high %v746_v36, %v746_v36  ;;  %1732 = vmatprep.subr.mxu0 %v1985_v0 }
 0x1e3   :  { %v778_v52 = vrot.slane %v748_v43, %v2094_v3  ;;  %1733 = vmatpush3.msra.mxu0 %v196_v62 }
 0x1e4   :  { %v782_v53 = vrot.slane %v750_v46, %v2094_v3  ;;  %1734 = vmatprep.subr.mxu0 %v1985_v0 }
 0x1e5   :  { %1735 = vmatpush3.msra.mxu0 %v195_v63 }
 0x1e6   :  { %1736 = vmatprep.subr.mxu0 %v1985_v0 }
 0x1e7   :  { %1737 = vmatpush3.msra.mxu0 %v194_v5 }
 0x1e8   :  { %1738 = vmatprep.subr.mxu0 %v1985_v0 }
 0x1e9   :  { %1739 = vmatpush3.msra.mxu0 %v193_v6 }
 0x1ea   :  { %1740 = vmatprep.subr.mxu0 %v1985_v0 }
 0x1eb   :  { %1741 = vmatpush3.msra.mxu0 %v192_v8 }
 0x1ec   :  { %1742 = vmatprep.subr.mxu0 %v1985_v0 }
 0x1ed   :  { %1743 = vmatpush3.msra.mxu0 %v191_v9 }
 0x1ee   :  { %1744 = vmatprep.subr.mxu0 %v1985_v0 }
 0x1ef   :  { %1745 = vmatpush3.msra.mxu0 %v190_v10 }
 0x1f0   :  { %1746 = vmatprep.subr.mxu0 %v1985_v0 }
 0x1f1   :  { %1747 = vmatpush3.msra.mxu0 %v189_v11 }
 0x1f2   :  { %1748 = vmatprep.subr.mxu0 %v1985_v0 }
 0x1f3   :  { %1749 = vmatpush3.msra.mxu0 %v188_v12 }
 0x1f4   :  { %v1622_v16 = vpop.f32.mrf.mxu1  ;;  %1750 = vmatprep.subr.mxu0 %v1985_v0 }
 0x1f5   :  { %v559_v18 = vadd.f32 %v1622_v16, %v486_v13 }
 0x1f6   :  { %v553_v21 = vpop.f32.mrf.mxu1 }
 0x1f7   :  { %v554_v23 = vadd.f32 %v553_v21, %v486_v13  ;;  %v792_v28 = vmul.f32 %v758_v19, %v559_v18 }
 0x1f8   :  { %v1625_v26 = vpop.f32.mrf.mxu1 }
 0x1f9   :  { %v791_v27 = vmul.f32 %v754_v17, %v554_v23  ;;  %v569_v29 = vadd.f32 %v1625_v26, %v486_v13 }
 0x1fa   :  { %v563_v31 = vpop.f32.mrf.mxu1 }
 0x1fb   :  { %v564_v32 = vadd.f32 %v563_v31, %v486_v13  ;;  %1708 = vmatprep.mubr.f32.mxu1 %v791_v27  ;;  %v794_v38 = vmul.f32 %v766_v30, %v569_v29 }
 0x1fc   :  { %v1628_v35 = vpop.f32.mrf.mxu1  ;;  %1709 = vmatmul.mubr.f32.vlgmr.msra.gmra.mxu1 %v792_v28 }
 0x1fd   :  { %v793_v37 = vmul.f32 %v762_v33, %v564_v32  ;;  %v579_v39 = vadd.f32 %v1628_v35, %v486_v13 }
 0x1fe   :  { %v573_v40 = vpop.f32.mrf.mxu1 }
 0x1ff   :  { %v574_v41 = vadd.f32 %v573_v40, %v486_v13  ;;  %1711 = vmatprep.mubr.f32.mxu1 %v793_v37  ;;  %v796_v48 = vmul.f32 %v774_v44, %v579_v39 }
 0x200   :  { %v1631_v45 = vpop.f32.mrf.mxu1  ;;  %1712 = vmatmul.mubr.f32.gmra.mxu1 %v794_v38 }
 0x201   :  { %v795_v47 = vmul.f32 %v770_v42, %v574_v41  ;;  %v589_v49 = vadd.f32 %v1631_v45, %v486_v13 }
 0x202   :  { %v583_v50 = vpop.f32.mrf.mxu1 }
 0x203   :  { %v584_v51 = vadd.f32 %v583_v50, %v486_v13  ;;  %1714 = vmatprep.mubr.f32.mxu1 %v795_v47  ;;  %v798_v55 = vmul.f32 %v782_v53, %v589_v49  ;;  %v187_v13 = vld [vmem:[#allocation10 + $0x180] sm:$0xff] }
 0x204   :  { %1715 = vmatmul.mubr.f32.gmra.mxu1 %v796_v48  ;;  %1751 = vmatpush3.msra.mxu0 %v187_v13 }
 0x205   :  { %v797_v54 = vmul.f32 %v778_v52, %v584_v51 }
 0x207   :  { %1717 = vmatprep.mubr.f32.mxu1 %v797_v54 }
 0x208   :  { %1718 = vmatmul.mubr.f32.gmra.mxu1 %v798_v55 }
 0x2bc   :  { %v1710_v14 = vpop.f32.mrf.mxu1 }
 0x2bd   :  { %v910_v15 = vrot.slane %v1710_v14, 4 }
 0x2be   :  { %v865_v16 = vpop.f32.mrf.mxu1 }
 0x2bf   :  { %v911_v17 = vmax.f32 %v1710_v14, %v910_v15  ;;  %v904_v18 = vrot.slane %v865_v16, 4 }
 0x2c0   :  { %v1713_v19 = vpop.f32.mrf.mxu1 }
 0x2c1   :  { %v912_v21 = vrot.slane %v911_v17, 2  ;;  %v905_v22 = vmax.f32 %v865_v16, %v904_v18  ;;  %v922_v23 = vrot.slane %v1713_v19, 4 }
 0x2c2   :  { %v875_v24 = vpop.f32.mrf.mxu1 }
 0x2c3   :  { %v913_v25 = vmax.f32 %v911_v17, %v912_v21  ;;  %v906_v26 = vrot.slane %v905_v22, 2  ;;  %v923_v27 = vmax.f32 %v1713_v19, %v922_v23  ;;  %v916_v28 = vrot.slane %v875_v24, 4 }
 0x2c4   :  { %v1716_v29 = vpop.f32.mrf.mxu1 }
 0x2c5   :  { %v914_v30 = vrot.slane %v913_v25, 1  ;;  %v907_v31 = vmax.f32 %v905_v22, %v906_v26  ;;  %v924_v32 = vrot.slane %v923_v27, 2  ;;  %v917_v0 = vmax.f32 %v875_v24, %v916_v28 }
 0x2c6   :  { %v934_v33 = vrot.slane %v1716_v29, 4  ;;  %v885_v34 = vpop.f32.mrf.mxu1 }
 0x2c7   :  { %v915_v35 = vmax.f32 %v913_v25, %v914_v30  ;;  %v908_v36 = vrot.slane %v907_v31, 1  ;;  %v925_v37 = vmax.f32 %v923_v27, %v924_v32  ;;  %v918_v38 = vrot.slane %v917_v0, 2 }
 0x2c8   :  { %v935_v39 = vmax.f32 %v1716_v29, %v934_v33  ;;  %v928_v40 = vrot.slane %v885_v34, 4  ;;  %v1719_v41 = vpop.f32.mrf.mxu1 }
 0x2c9   :  { %v953_v42 = vsub.f32 %v1710_v14, %v915_v35  ;;  %v909_v43 = vmax.f32 %v907_v31, %v908_v36  ;;  %v926_v44 = vrot.slane %v925_v37, 1  ;;  %v919_v45 = vmax.f32 %v917_v0, %v918_v38 }
 0x2ca   :  { %v936_v46 = vrot.slane %v935_v39, 2  ;;  %v929_v47 = vmax.f32 %v885_v34, %v928_v40  ;;  %v946_v48 = vrot.slane %v1719_v41, 4  ;;  %v895_v49 = vpop.f32.mrf.mxu1 }
 0x2cb   :  { %v962_v50 = vmul.f32 1.442695, %v953_v42  ;;  %v952_v51 = vsub.f32 %v865_v16, %v909_v43  ;;  %v927_v52 = vmax.f32 %v925_v37, %v926_v44  ;;  %v920_v53 = vrot.slane %v919_v45, 1 }
 0x2cc   :  { %v937_v54 = vmax.f32 %v935_v39, %v936_v46  ;;  %v930_v55 = vrot.slane %v929_v47, 2  ;;  %v947_v56 = vmax.f32 %v1719_v41, %v946_v48  ;;  %v940_v57 = vrot.slane %v895_v49, 4 }
 0x2cd   :  { %1768 = vpow2.f32 %v962_v50  ;;  %v960_v58 = vmul.f32 1.442695, %v952_v51  ;;  %v955_v59 = vsub.f32 %v1713_v19, %v927_v52  ;;  %v921_v60 = vmax.f32 %v919_v45, %v920_v53 }
 0x2ce   :  { %v938_v61 = vrot.slane %v937_v54, 1  ;;  %v931_v62 = vmax.f32 %v929_v47, %v930_v55  ;;  %v948_v63 = vrot.slane %v947_v56, 2  ;;  %v941_v5 = vmax.f32 %v895_v49, %v940_v57  ;;  %v1666_v47 = vpop.f32.mrf.mxu0 }
 0x2cf   :  { %1770 = vpow2.f32 %v960_v58  ;;  %v966_v6 = vmul.f32 1.442695, %v955_v59  ;;  %v954_v8 = vsub.f32 %v875_v24, %v921_v60 }
 0x2d0   :  { %v939_v9 = vmax.f32 %v937_v54, %v938_v61  ;;  %v932_v10 = vrot.slane %v931_v62, 1  ;;  %v949_v11 = vmax.f32 %v947_v56, %v948_v63  ;;  %v942_v12 = vrot.slane %v941_v5, 2  ;;  %v662_v60 = vpop.f32.mrf.mxu0 }
 0x2d1   :  { %1772 = vpow2.f32 %v966_v6  ;;  %v964_v13 = vmul.f32 1.442695, %v954_v8 }
 0x2d2   :  { %v957_v14 = vsub.f32 %v1716_v29, %v939_v9  ;;  %v933_v15 = vmax.f32 %v931_v62, %v932_v10  ;;  %v950_v16 = vrot.slane %v949_v11, 1  ;;  %v943_v17 = vmax.f32 %v941_v5, %v942_v12 }
 0x2d3   :  { %1774 = vpow2.f32 %v964_v13 }
 0x2d4   :  { %v970_v18 = vmul.f32 1.442695, %v957_v14  ;;  %v956_v19 = vsub.f32 %v885_v34, %v933_v15  ;;  %v951_v21 = vmax.f32 %v949_v11, %v950_v16  ;;  %v944_v22 = vrot.slane %v943_v17, 1  ;;  %v1669_v14 = vpop.f32.mrf.mxu0 }
 0x2d6   :  { %1776 = vpow2.f32 %v970_v18  ;;  %v968_v23 = vmul.f32 1.442695, %v956_v19  ;;  %v959_v25 = vsub.f32 %v1719_v41, %v951_v21  ;;  %v945_v26 = vmax.f32 %v943_v17, %v944_v22 }
 0x2d7   :  { %v594_v19 = vsub.s32 4, %v2091_v2 }
 0x2d8   :  { %1778 = vpow2.f32 %v968_v23  ;;  %v974_v24 = vmul.f32 1.442695, %v959_v25  ;;  %v958_v27 = vsub.f32 %v895_v49, %v945_v26  ;;  %v2173_v26 = vand.u32 127, %v222_v1 }
 0x2da   :  { %v2139_v28 = vpop.eup %1768  ;;  %1780 = vpow2.f32 %v974_v24  ;;  %v972_v30 = vmul.f32 1.442695, %v958_v27  ;;  %v672_v24 = vpop.f32.mrf.mxu0  ;;  %vm1195_vm2 = vcmp.lt.s32.totalorder %v2173_v26, 32 }
 0x2db   :  { %v982_v29 = vrot.slane %v2139_v28, 4 }
 0x2dc   :  { %v2142_v31 = vpop.eup %1770  ;;  %1782 = vpow2.f32 %v972_v30 }
 0x2dd   :  { %v983_v32 = vadd.f32 %v2139_v28, %v982_v29  ;;  %v976_v0 = vrot.slane %v2142_v31, 4 }
 0x2de   :  { %v2146_v33 = vpop.eup %1772 }
 0x2df   :  { %v984_v34 = vrot.slane %v983_v32, 2  ;;  %v977_v35 = vadd.f32 %v2142_v31, %v976_v0  ;;  %v994_v36 = vrot.slane %v2146_v33, 4 }
 0x2e0   :  { %v2150_v37 = vpop.eup %1774 }
 0x2e1   :  { %v985_v38 = vadd.f32 %v984_v34, %v983_v32  ;;  %v978_v39 = vrot.slane %v977_v35, 2  ;;  %v995_v40 = vadd.f32 %v2146_v33, %v994_v36  ;;  %v988_v41 = vrot.slane %v2150_v37, 4  ;;  %v1672_v36 = vpop.f32.mrf.mxu0 }
 0x2e2   :  { %v595_v32 = vrot.slane %v2096_v4, %v594_v19 }
 0x2e3   :  { %v2154_v42 = vpop.eup %1776  ;;  %v986_v43 = vrot.slane %v985_v38, 1  ;;  %v979_v44 = vadd.f32 %v978_v39, %v977_v35  ;;  %v996_v45 = vrot.slane %v995_v40, 2  ;;  %v989_v46 = vadd.f32 %v2150_v37, %v988_v41 }
 0x2e4   :  { %v1006_v48 = vrot.slane %v2154_v42, 4  ;;  %v668_v39 = vadd.f32 %v1666_v47, %v595_v32  ;;  %v663_v41 = vadd.f32 %v662_v60, %v595_v32 }
 0x2e5   :  { %v2158_v49 = vpop.eup %1778  ;;  %v987_v50 = vadd.f32 %v986_v43, %v985_v38  ;;  %v980_v51 = vrot.slane %v979_v44, 1  ;;  %v997_v52 = vadd.f32 %v996_v45, %v995_v40  ;;  %v990_v53 = vrot.slane %v989_v46, 2 }
 0x2e6   :  { %v1007_v54 = vadd.f32 %v2154_v42, %v1006_v48  ;;  %v1000_v55 = vrot.slane %v2158_v49, 4  ;;  %v682_v48 = vpop.f32.mrf.mxu0 }
 0x2e7   :  { %v2162_v56 = vpop.eup %1780  ;;  %1784 = vrcp.f32 %v987_v50  ;;  %v981_v57 = vadd.f32 %v980_v51, %v979_v44  ;;  %v998_v58 = vrot.slane %v997_v52, 1  ;;  %v991_v59 = vadd.f32 %v990_v53, %v989_v46 }
 0x2e8   :  { %v1008_v61 = vrot.slane %v1007_v54, 2  ;;  %v1001_v62 = vadd.f32 %v2158_v49, %v1000_v55  ;;  %v1018_v63 = vrot.slane %v2162_v56, 4  ;;  %v678_v50 = vadd.f32 %v1669_v14, %v595_v32 }
 0x2e9   :  { %v2166_v5 = vpop.eup %1782  ;;  %1786 = vrcp.f32 %v981_v57  ;;  %v999_v6 = vadd.f32 %v998_v58, %v997_v52  ;;  %v992_v8 = vrot.slane %v991_v59, 1  ;;  %v673_v53 = vadd.f32 %v672_v24, %v595_v32  ;;  %v1675_v58 = vpop.f32.mrf.mxu0 }
 0x2ea   :  { %v1009_v9 = vadd.f32 %v1008_v61, %v1007_v54  ;;  %v1002_v10 = vrot.slane %v1001_v62, 2  ;;  %v1019_v11 = vadd.f32 %v2162_v56, %v1018_v63  ;;  %v1012_v12 = vrot.slane %v2166_v5, 4 }
 0x2eb   :  { %1788 = vrcp.f32 %v999_v6  ;;  %v993_v13 = vadd.f32 %v992_v8, %v991_v59  ;;  %v688_v6 = vadd.f32 %v1672_v36, %v595_v32 }
 0x2ec   :  { %v1003_v15 = vadd.f32 %v1002_v10, %v1001_v62  ;;  %v1013_v16 = vadd.f32 %v2166_v5, %v1012_v12  ;;  %v1010_v17 = vrot.slane %v1009_v9, 1  ;;  %v1020_v18 = vrot.slane %v1019_v11, 2 }
 0x2ed   :  { %1790 = vrcp.f32 %v993_v13  ;;  %v683_v12 = vadd.f32 %v682_v48, %v595_v32  ;;  %v692_v13 = vpop.f32.mrf.mxu0 }
 0x2ee   :  { %v1004_v21 = vrot.slane %v1003_v15, 1  ;;  %v1014_v22 = vrot.slane %v1013_v16, 2  ;;  %v1011_v23 = vadd.f32 %v1010_v17, %v1009_v9  ;;  %v1021_v25 = vadd.f32 %v1020_v18, %v1019_v11 }
 0x2f0   :  { %v1015_v27 = vadd.f32 %v1014_v22, %v1013_v16  ;;  %v1005_v30 = vadd.f32 %v1004_v21, %v1003_v15  ;;  %v1022_v29 = vrot.slane %v1021_v25, 1  ;;  %1792 = vrcp.f32 %v1011_v23 }
 0x2f2   :  { %v1016_v0 = vrot.slane %v1015_v27, 1  ;;  %v1023_v34 = vadd.f32 %v1022_v29, %v1021_v25  ;;  %1794 = vrcp.f32 %v1005_v30  ;;  %v693_v30 = vadd.f32 %v692_v13, %v595_v32 }
 0x2f4   :  { %v1785_v35 = vpop.eup %1784  ;;  %v1017_v38 = vadd.f32 %v1016_v0, %v1015_v27  ;;  %1796 = vrcp.f32 %v1023_v34 }
 0x2f5   :  { %v1033_v1 = vmul.f32 %v1785_v35, %v2139_v28 }
 0x2f6   :  { %v1787_v40 = vpop.eup %1786  ;;  %1798 = vrcp.f32 %v1017_v38 }
 0x2f7   :  { %v2179_v43 = vmul.f32 %v1787_v40, %v2142_v31  ;;  %v1041_v44 = vmul.f32 %v1033_v1, %v668_v39  ;;  %v2183_v45 = vsel %vm1195_vm2, %v1033_v1, 0.0 }
 0x2f8   :  { %v1789_v46 = vpop.eup %1788 }
 0x2f9   :  { %v1035_v51 = vmul.f32 %v1789_v46, %v2146_v33  ;;  %v1040_v47 = vmul.f32 %v2179_v43, %v663_v41  ;;  %v1054_v52 = vrot.slane %v1041_v44, 4 }
 0x2fa   :  { %v1791_v28 = vpop.eup %1790 }
 0x2fb   :  { %v2188_v54 = vmul.f32 %v1791_v28, %v2150_v37  ;;  %v1043_v31 = vmul.f32 %v1035_v51, %v678_v50  ;;  %v1048_v55 = vrot.slane %v1040_v47, 4  ;;  %v1055_v57 = vadd.f32 %v1054_v52, %v1041_v44 }
 0x2fc   :  { %v2192_v59 = vsel %vm1195_vm2, %v1035_v51, 0.0 }
 0x2fd   :  { %v1793_v60 = vpop.eup %1792  ;;  %v1042_v61 = vmul.f32 %v2188_v54, %v673_v53  ;;  %v1049_v33 = vadd.f32 %v1048_v55, %v1040_v47  ;;  %v1056_v62 = vrot.slane %v1055_v57, 2  ;;  %v1066_v63 = vrot.slane %v1043_v31, 4 }
 0x2fe   :  { %v1037_v8 = vmul.f32 %v1793_v60, %v2154_v42  ;;  %v698_v42 = vadd.f32 %v1675_v58, %v595_v32 }
 0x2ff   :  { %v1795_v9 = vpop.eup %1794  ;;  %v1050_v37 = vrot.slane %v1049_v33, 2  ;;  %v1060_v10 = vrot.slane %v1042_v61, 4  ;;  %v1067_v11 = vadd.f32 %v1066_v63, %v1043_v31  ;;  %v1057_v19 = vadd.f32 %v1056_v62, %v1055_v57 }
 0x300   :  { %v2197_v14 = vmul.f32 %v1795_v9, %v2158_v49  ;;  %v1045_v15 = vmul.f32 %v1037_v8, %v688_v6  ;;  %v2201_v16 = vsel %vm1195_vm2, %v1037_v8, 0.0 }
 0x301   :  { %v1797_v17 = vpop.eup %1796  ;;  %v1051_v18 = vadd.f32 %v1050_v37, %v1049_v33  ;;  %v1061_v21 = vadd.f32 %v1060_v10, %v1042_v61  ;;  %v1068_v22 = vrot.slane %v1067_v11, 2  ;;  %v1058_v38 = vrot.slane %v1057_v19, 1 }
 0x302   :  { %v1039_v23 = vmul.f32 %v1797_v17, %v2162_v56  ;;  %v1044_v25 = vmul.f32 %v2197_v14, %v683_v12  ;;  %v1078_v24 = vrot.slane %v1045_v15, 4 }
 0x303   :  { %v1799_v27 = vpop.eup %1798  ;;  %v1052_v49 = vrot.slane %v1051_v18, 1  ;;  %v1062_v29 = vrot.slane %v1061_v21, 2  ;;  %v1069_v1 = vadd.f32 %v1068_v22, %v1067_v11  ;;  %v1059_v47 = vadd.f32 %v1058_v38, %v1057_v19 }
 0x304   :  { %v2206_v0 = vmul.f32 %v1799_v27, %v2166_v5  ;;  %v1047_v34 = vmul.f32 %v1039_v23, %v698_v42  ;;  %v1072_v35 = vrot.slane %v1044_v25, 4  ;;  %v1079_v36 = vadd.f32 %v1078_v24, %v1045_v15 }
 0x305   :  { %v1063_v39 = vadd.f32 %v1062_v29, %v1061_v21  ;;  %v2210_v40 = vsel %vm1195_vm2, %v1039_v23, 0.0  ;;  %v1053_v46 = vadd.f32 %v1052_v49, %v1051_v18  ;;  %v1070_v28 = vrot.slane %v1069_v1, 1 }
 0x306   :  { %v1046_v56 = vmul.f32 %v2206_v0, %v693_v30  ;;  %v1073_v41 = vadd.f32 %v1072_v35, %v1044_v25  ;;  %v1080_v44 = vrot.slane %v1079_v36, 2  ;;  %v1090_v32 = vrot.slane %v1047_v34, 4 }
 0x307   :  { %v1064_v48 = vrot.slane %v1063_v39, 1  ;;  %v1109_v58 = vsel %vm1108_vm3, %v1059_v47, %v1053_v46  ;;  %v1071_v63 = vadd.f32 %v1070_v28, %v1069_v1  ;;  %v1098_v22 = vsub.s32 5, %v2091_v2 }
 0x308   :  { %v1074_v5 = vrot.slane %v1073_v41, 2  ;;  %v1084_v50 = vrot.slane %v1046_v56, 4  ;;  %v1091_v51 = vadd.f32 %v1090_v32, %v1047_v34  ;;  %v1081_v53 = vadd.f32 %v1080_v44, %v1079_v36 }
 0x309   :  { %v1065_v52 = vadd.f32 %v1064_v48, %v1063_v39  ;;  %v1099_v42 = vrot.slane %v2096_v4, %v1098_v22  ;;  %v1198_v49 = vsel %vm1195_vm2, %v2179_v43, 0.0  ;;  %v1200_v29 = vsel %vm1195_vm2, %v2188_v54, 0.0 }
 0x30a   :  { %v1075_v31 = vadd.f32 %v1074_v5, %v1073_v41  ;;  %v1085_v55 = vadd.f32 %v1084_v50, %v1046_v56  ;;  %v1092_v57 = vrot.slane %v1091_v51, 2  ;;  %v1082_v6 = vrot.slane %v1081_v53, 1 }
 0x30b   :  { %v1111_v62 = vsel %vm1110_vm4, %v1065_v52, %v1109_v58  ;;  %v1202_v4 = vsel %vm1195_vm2, %v2197_v14, 0.0  ;;  %v1204_v34 = vsel %vm1195_vm2, %v2206_v0, 0.0  ;;  %v1296_v54 = vsub.s32 6, %v2091_v2  ;;  %v1804_v14 = vld [vmem:[#allocation11] sm:$0xff] }
 0x30c   :  { %v1076_v60 = vrot.slane %v1075_v31, 1  ;;  %v1086_v61 = vrot.slane %v1085_v55, 2  ;;  %v1093_v33 = vadd.f32 %v1092_v57, %v1091_v51  ;;  %v1113_v10 = vsel %vm1112_vm5, %v1071_v63, %v1111_v62 }
 0x30d   :  { %v1083_v13 = vadd.f32 %v1082_v6, %v1081_v53  ;;  %v1301_v41 = vsub.s32 7, %v2091_v2  ;;  %v1297_v32 = vrot.slane %v1804_v14, %v1296_v54 }
 0x30e   :  { %v1077_v8 = vadd.f32 %v1076_v60, %v1075_v31  ;;  %v1087_v9 = vadd.f32 %v1086_v61, %v1085_v55  ;;  %v1094_v37 = vrot.slane %v1093_v33, 1 }
 0x30f   :  { %v1302_v5 = vrot.slane %v1804_v14, %v1301_v41 }
 0x310   :  { %v1088_v11 = vrot.slane %v1087_v9, 1  ;;  %v1115_v12 = vsel %vm1114_vm6, %v1077_v8, %v1113_v10  ;;  %v1095_v17 = vadd.f32 %v1094_v37, %v1093_v33 }
 0x311   :  { %v1117_v18 = vsel %vm1116_vm7, %v1083_v13, %v1115_v12 }
 0x312   :  { %v1089_v15 = vadd.f32 %v1088_v11, %v1087_v9 }
 0x314   :  { %v1119_v19 = vsel %vm1118_vm8, %v1089_v15, %v1117_v18 }
 0x315   :  { %v1121_v21 = vsel %vm1120_vm9, %v1095_v17, %v1119_v19 }
 0x316   :  { %1753 = vmatmul.mubr.f32.vlgmr.msra.gmra.mxu0 %v1121_v21 }
 0x3d6   :  { %v1189_v23 = vpop.f32.mrf.mxu0 }
 0x3d7   :  { %v1190_v25 = vadd.f32 %v1189_v23, %v1099_v42  ;;  %v221_v23 = vld [vmem:[#allocation11 + $0x8] sm:$0xff] }
 0x3d8   :  { %v1754_v24 = vpop.f32.mrf.mxu0 }
 0x3d9   :  { %v1280_v27 = vadd.f32 %v1190_v25, %v2100_v7 }
 0x3db   :  { %1281 = vadd.xlane.f32.xlu0 %v1280_v27  ;;  %v1284_v30 = vmul.f32 %v1280_v27, %v1280_v27 }
 0x3df   :  { %1285 = vadd.xlane.f32.xlu0 %v1284_v30 }
 0x3e3   :  { %1206 = vadd.xlane.f32.xlu0 %v1198_v49 }
 0x3e7   :  { %1210 = vadd.xlane.f32.xlu0 %v1200_v29  ;;  %v1321_v29 = vrot.slane %v221_v23, %v2094_v3 }
 0x3eb   :  { %1214 = vadd.xlane.f32.xlu0 %v1202_v4 }
 0x3ef   :  { %1218 = vadd.xlane.f32.xlu0 %v1204_v34 }
 0x464   :  { %v1282_v35 = vpop.xlane.xlu0 %1281 }
 0x465   :  { %v1283_v36 = vmul.f32 0.03125, %v1282_v35 }
 0x467   :  { %v1288_v43 = vmul.f32 %v1283_v36, %v1283_v36  ;;  %v1290_v44 = vsub.f32 %v1280_v27, %v1283_v36  ;;  %v1326_v36 = vrot.slane %v221_v23, %v302_v20 }
 0x468   :  { %v1286_v38 = vpop.xlane.xlu0 %1285 }
 0x469   :  { %v1287_v39 = vmul.f32 0.03125, %v1286_v38 }
 0x46b   :  { %v1289_v1 = vsub.f32 %v1287_v39, %v1288_v43 }
 0x46c   :  { %v1207_v52 = vpop.xlane.xlu0 %1206 }
 0x46d   :  { %v1291_v56 = vadd.f32 1e-05, %v1289_v1  ;;  %v1222_v60 = vmul.f32 0.03125, %v1207_v52 }
 0x46f   :  { %1800 = vrsqrt.f32 %v1291_v56 }
 0x470   :  { %v1211_v31 = vpop.xlane.xlu0 %1210 }
 0x471   :  { %v1224_v63 = vmul.f32 0.03125, %v1211_v31 }
 0x47c   :  { %v1801_v46 = vpop.eup %1800 }
 0x47d   :  { %v1293_v48 = vmul.f32 %v1801_v46, %v1290_v44 }
 0x47f   :  { %v1298_v0 = vmul.f32 %v1297_v32, %v1293_v48 }
 0x481   :  { %v1303_v50 = vadd.f32 %v1302_v5, %v1298_v0 }
 0x483   :  { %v1304_v51 = vadd.f32 %v1303_v50, %v2100_v7  ;;  %v1240_v7 = vsub.s32 %v2173_v26, %v2091_v2 }
 0x485   :  { %1305 = vadd.xlane.f32.xlu1 %v1304_v51  ;;  %v1308_v47 = vmul.f32 %v1304_v51, %v1304_v51  ;;  %v1249_v37 = vrot.slane %v1224_v63, %v1240_v7 }
 0x489   :  { %1309 = vadd.xlane.f32.xlu1 %v1308_v47 }
 0x48d   :  { %1208 = vadd.xlane.f32.xlu1 %v2183_v45  ;;  %v1215_v45 = vpop.xlane.xlu0 %1214 }
 0x48e   :  { %v1226_v10 = vmul.f32 0.03125, %v1215_v45 }
 0x490   :  { %v1257_v18 = vrot.slane %v1226_v10, %v1240_v7 }
 0x491   :  { %1212 = vadd.xlane.f32.xlu1 %v2192_v59  ;;  %v1219_v11 = vpop.xlane.xlu0 %1218 }
 0x492   :  { %v1228_v19 = vmul.f32 0.03125, %v1219_v11 }
 0x494   :  { %v1265_v27 = vrot.slane %v1228_v19, %v1240_v7 }
 0x495   :  { %1216 = vadd.xlane.f32.xlu1 %v2201_v16  ;;  %v1241_v16 = vrot.slane %v1222_v60, %v1240_v7 }
 0x499   :  { %1220 = vadd.xlane.f32.xlu1 %v2210_v40 }
 0x50e   :  { %v1306_v28 = vpop.xlane.xlu1 %1305 }
 0x50f   :  { %v1307_v53 = vmul.f32 0.03125, %v1306_v28 }
 0x511   :  { %v1312_v57 = vmul.f32 %v1307_v53, %v1307_v53  ;;  %v1314_v30 = vsub.f32 %v1304_v51, %v1307_v53 }
 0x512   :  { %v1310_v55 = vpop.xlane.xlu1 %1309 }
 0x513   :  { %v1311_v58 = vmul.f32 0.03125, %v1310_v55 }
 0x515   :  { %v1313_v61 = vsub.f32 %v1311_v58, %v1312_v57 }
 0x516   :  { %v1209_v33 = vpop.xlane.xlu1 %1208 }
 0x517   :  { %v1315_v62 = vadd.f32 1e-05, %v1313_v61  ;;  %v1223_v59 = vmul.f32 0.03125, %v1209_v33 }
 0x519   :  { %1802 = vrsqrt.f32 %v1315_v62  ;;  %v1245_v40 = vrot.slane %v1223_v59, %v1240_v7 }
 0x51a   :  { %v1213_v6 = vpop.xlane.xlu1 %1212 }
 0x51b   :  { %v1270_v8 = vsel %vm1108_vm3, %v1245_v40, %v1241_v16  ;;  %v1225_v9 = vmul.f32 0.03125, %v1213_v6 }
 0x51c   :  { %v1271_v26 = vsel %vm1110_vm4, %v1249_v37, %v1270_v8 }
 0x51d   :  { %v1253_v12 = vrot.slane %v1225_v9, %v1240_v7 }
 0x51e   :  { %v1217_v13 = vpop.xlane.xlu1 %1216 }
 0x51f   :  { %v1272_v15 = vsel %vm1112_vm5, %v1253_v12, %v1271_v26  ;;  %v1227_v17 = vmul.f32 0.03125, %v1217_v13 }
 0x520   :  { %v1273_v22 = vsel %vm1114_vm6, %v1257_v18, %v1272_v15 }
 0x521   :  { %v1261_v21 = vrot.slane %v1227_v17, %v1240_v7 }
 0x522   :  { %v1221_v42 = vpop.xlane.xlu1 %1220 }
 0x523   :  { %v1274_v25 = vsel %vm1116_vm7, %v1261_v21, %v1273_v22  ;;  %v1229_v24 = vmul.f32 0.03125, %v1221_v42 }
 0x524   :  { %v1275_v34 = vsel %vm1118_vm8, %v1265_v27, %v1274_v25 }
 0x525   :  { %v1269_v49 = vrot.slane %v1229_v24, %v1240_v7 }
 0x526   :  { %v1803_v4 = vpop.eup %1802 }
 0x527   :  { %v1317_v35 = vmul.f32 %v1803_v4, %v1314_v30  ;;  %v1276_v38 = vsel %vm1120_vm9, %v1269_v49, %v1275_v34 }
 0x528   :  { %v1279_v43 = vsel %vm1278_vm10, %v1276_v38, 0.0 }
 0x529   :  { %v1322_v39 = vmul.f32 %v1321_v29, %v1317_v35  ;;  %1329 = vst [vmem:[#allocation14] sm:$0xff] %v1279_v43 }
 0x52a   :  { %1936 = shalt.err (!%p1933_p6)
}
 0x52b   :  { %1349 = dma.vmem_to_hbm [thread:$0]  %s1347_s5, 128, %s2267_s7, [#allocation15]   ;;  %v1327_v2 = vadd.f32 %v1326_v36, %v1322_v39 }
 0x52c   :  { %s1945_s11 = scalar_lea.vmem %s1337_s28, 128  ;;  %p1950_p8 = scmp.lt.s32.totalorder %s1337_s28, %s1337_s28 }
 0x52d   :  { %1328 = vst [vmem:[#allocation13] sm:$0xff] %v1327_v2  ;;  %p1946_p7 = scmp.ne.s32.totalorder %s1337_s28, %s1945_s11  ;;  %p1951_p9 = scmp.lt.s32.totalorder %s1945_s11, %s1945_s11 }
 0x52f   :  { %p1952_p10 = por %p1951_p9, %p1950_p8 }
 0x531   :  { %p1953_p11 = pnand %p1952_p10, %p1946_p7 }
 0x533   :  { %1956 = shalt.err (!%p1953_p11)
}
 0x534   :  { %1339 = dma.vmem_to_hbm [thread:$0]  %s1337_s28, 128, %s2266_s6, [#allocation4]  }
 0x535   :  { %1973 = dma.done.wait [#allocation4], 128  }
 0x536   :  { %1974 = vsyncadd [#allocation4], 4294967168 }
 0x537   :  { %1975 = dma.done.wait [#allocation15], 128  }
 0x538   :  { %1976 = vsyncadd [#allocation15], 4294967168 }
 0x539   :  { %1356 = vsyncpa [#allocation3], 1 }
 0x53a   :  { %1357 = vsyncpa [#allocation6], 1 }
 0x53b   :  { %1358 = vsyncpa [#allocation9], 1 }
 0x53c   :  { %1359 = vsyncpa [#allocation12], 1 }
 0x53d   :  { %1360 = vsyncpa [#allocation4], 1 }
 0x53e   :  { %1361 = vsyncpa [#allocation15], 1 }

</bundles_post_ra>
